<compile_context>
chip_gen: v6e
topology: v6e:2x2x1
jax: 0.10.0
libtpu: 0.0.40
codegen_flags: <defaults>
</compile_context>

<pallas_src>
import functools

import numpy as np
import jax
import jax.numpy as jnp
from jax.experimental import pallas as pl
from jax.experimental.pallas import tpu as pltpu


# ---------------------------------------------------------------------------
# Host-side constant builders
# ---------------------------------------------------------------------------
def _interp_matrix(n_in, n_out):
    """Interpolation matrix for torch Upsample(bilinear, align_corners=True)."""
    m = np.zeros((n_out, n_in), np.float32)
    if n_in == 1 or n_out == 1:
        m[:, 0] = 1.0
        return m
    scale = (n_in - 1) / (n_out - 1)
    for i in range(n_out):
        src = i * scale
        i0 = min(int(np.floor(src)), n_in - 1)
        i1 = min(i0 + 1, n_in - 1)
        f = src - i0
        m[i, i0] += 1.0 - f
        m[i, i1] += f
    return m


def _up_pad_matrix(n_in, n_out, pad0):
    """2x bilinear (align_corners=True) interp rows embedded at offset pad0.

    (n_out, n_in) matrix implementing Upsample(scale=2) followed by the
    F.pad size-matching in Up.forward (negative pad0 == crop), so the pad is
    folded into a constant and the kernel needs no branch.
    """
    base = _interp_matrix(n_in, 2 * n_in)          # (2*n_in, n_in)
    m = np.zeros((n_out, n_in), np.float32)
    for y in range(n_out):
        src = y - pad0
        if 0 <= src < 2 * n_in:
            m[y] = base[src]
    return m


def _col_masks(h, w):
    """(3, 1, H*W) lane masks; mask[dx+1] zeroes columns that wrap rows."""
    col = np.arange(h * w, dtype=np.int64) % w
    m = np.stack([((col + dx >= 0) & (col + dx < w)).astype(np.float32)
                  for dx in (-1, 0, 1)])
    return jnp.asarray(m.reshape(3, 1, h * w))


def _gemm_weights(w):
    """(C_out, C_in, 3, 3) -> lane-dense (C_out, 9*C_in); col = tap*C_in + c,
    tap = (dy+1)*3 + (dx+1).  Matches the tap-major im2col built in-kernel."""
    c_out, c_in = w.shape[:2]
    return jnp.transpose(w, (0, 2, 3, 1)).reshape(c_out, 9 * c_in)


def _left_halo(w):
    return ((w + 1 + 127) // 128) * 128            # 128-aligned, >= w+1


# ---------------------------------------------------------------------------
# In-kernel helpers
# ---------------------------------------------------------------------------
def _conv3x3_gemm_in_relu(w_ref, m_ref, halo_ref, col_ref, *,
                          c_in, lpad, hw, width, eps=1e-5):
    """3x3 'same' conv (single im2col GEMM) + InstanceNorm2d + ReLU.

    halo_ref rows [:c_in], cols [lpad, lpad+hw) must already hold the input
    (H*W flattened on the lane axis); every halo column must be zero.
    Returns the (C_out, hw) float32 result.
    """
    tap = 0
    for dy in (-1, 0, 1):
        for dx in (-1, 0, 1):
            d = dy * width + dx
            xs = halo_ref[:c_in, lpad + d: lpad + d + hw]
            if dx != 0:
                xs = xs * m_ref[dx + 1]            # zero horizontal wrap
            col_ref[tap * c_in:(tap + 1) * c_in, :] = xs
            tap += 1
    acc = jnp.dot(w_ref[...], col_ref[:9 * c_in, :],
                  preferred_element_type=jnp.float32)        # (C_out, hw)
    mu = jnp.mean(acc, axis=-1, keepdims=True)
    xc = acc - mu
    var = jnp.mean(xc * xc, axis=-1, keepdims=True)
    return jnp.maximum(xc * jax.lax.rsqrt(var + eps), 0.0)


def _up_block_kernel(x2_ref, x1_ref, lh_ref, lwt_ref, m_ref, w1_ref, w2_ref,
                     o_ref, halo_ref, col_ref, up_ref, *,
                     height, width, lpad, c_skip, c_up, c_mid):
    f32 = jnp.float32
    hw = height * width
    n_halo_rows = halo_ref.shape[0]

    # Zero ONLY the halo columns; the interior is fully overwritten below.
    halo_ref[:, :lpad] = jnp.zeros((n_halo_rows, lpad), f32)
    halo_ref[:, lpad + hw:lpad + hw + width + 1] = jnp.zeros(
        (n_halo_rows, width + 1), f32)

    # ---- bilinear 2x upsample (+ folded F.pad) of x1, per channel ----------
    for c in range(c_up):
        t = jnp.dot(lh_ref[...], x1_ref[0, c].astype(f32),
                    preferred_element_type=f32)              # (H, W_in)
        up_ref[c * height:(c + 1) * height, :] = jnp.dot(
            t, lwt_ref[...], preferred_element_type=f32)     # (H, W)

    # ---- deposit conv1 inputs into the halo interior (fused concat) --------
    # rows [0, c_skip)          : x2 (skip connection), already flat (HW)
    # rows [c_skip, c_skip+c_up): upsampled x1, copied row by row
    halo_ref[:c_skip, lpad:lpad + hw] = x2_ref[0].astype(f32)
    # TODO(synk): replace the unrolled per-row deposit with a single
    # (C, H, W) -> (C, H*W) reshape once Mosaic supports that shape cast.
    for c in range(c_up):
        for y in range(height):
            halo_ref[c_skip + c:c_skip + c + 1,
                     lpad + y * width:lpad + (y + 1) * width] = (
                         up_ref[c * height + y:c * height + y + 1, :])

    # ---- conv1 (im2col GEMM) + InstanceNorm + ReLU --------------------------
    h = _conv3x3_gemm_in_relu(w1_ref, m_ref, halo_ref, col_ref,
                              c_in=c_skip + c_up, lpad=lpad, hw=hw,
                              width=width)

    # ---- conv2 (im2col GEMM) + InstanceNorm + ReLU --------------------------
    halo_ref[:c_mid, lpad:lpad + hw] = h
    out = _conv3x3_gemm_in_relu(w2_ref, m_ref, halo_ref, col_ref,
                                c_in=c_mid, lpad=lpad, hw=hw, width=width)
    o_ref[0] = out.astype(o_ref.dtype)


# ---------------------------------------------------------------------------
# Up.forward (bilinear path) — single fused pallas_call over the batch
# ---------------------------------------------------------------------------
def up_forward(x1, x2, w_conv1, w_conv2):
    n, c1, h_in, w_in = x1.shape
    n2, c2, h, w = x2.shape
    assert n == n2
    c_mid = w_conv1.shape[0]
    c_out = w_conv2.shape[0]
    assert w_conv1.shape[1] == c1 + c2 and w_conv2.shape[1] == c_mid
    cc = c1 + c2
    hw = h * w
    lpad = _left_halo(w)
    halo_w = lpad + hw + w + 1

    # F.pad offsets (negative -> crop), folded into the interp matrices.
    pad_y0 = (h - 2 * h_in) // 2
    pad_x0 = (w - 2 * w_in) // 2
    lh = jnp.asarray(_up_pad_matrix(h_in, h, pad_y0))        # (H, H_in)
    lwt = jnp.asarray(_up_pad_matrix(w_in, w, pad_x0).T)     # (W_in, W)

    w1_g = _gemm_weights(w_conv1)                            # (c_mid, 9*cc)
    w2_g = _gemm_weights(w_conv2)                            # (c_out, 9*c_mid)
    masks = _col_masks(h, w)

    kernel = functools.partial(
        _up_block_kernel, height=h, width=w, lpad=lpad,
        c_skip=c2, c_up=c1, c_mid=c_mid)

    out = pl.pallas_call(
        kernel,
        out_shape=jax.ShapeDtypeStruct((n, c_out, hw), x2.dtype),
        grid_spec=pltpu.PrefetchScalarGridSpec(
            num_scalar_prefetch=0,
            grid=(n,),
            in_specs=[
                pl.BlockSpec((1, c2, hw), lambda i: (i, 0, 0)),
                pl.BlockSpec((1, c1, h_in, w_in), lambda i: (i, 0, 0, 0)),
                pl.BlockSpec((h, h_in), lambda i: (0, 0)),
                pl.BlockSpec((w_in, w), lambda i: (0, 0)),
                pl.BlockSpec((3, 1, hw), lambda i: (0, 0, 0)),
                pl.BlockSpec((c_mid, 9 * cc), lambda i: (0, 0)),
                pl.BlockSpec((c_out, 9 * c_mid), lambda i: (0, 0)),
            ],
            out_specs=pl.BlockSpec((1, c_out, hw), lambda i: (i, 0, 0)),
            scratch_shapes=[
                pltpu.VMEM((max(cc, c_mid), halo_w), jnp.float32),   # halo
                pltpu.VMEM((9 * max(cc, c_mid), hw), jnp.float32),   # im2col
                pltpu.VMEM((c1 * h, w), jnp.float32),                # upsample
            ],
        ),
        compiler_params=pltpu.CompilerParams(
            dimension_semantics=("parallel",)),
    )(x2.reshape(n, c2, hw), x1, lh, lwt, masks, w1_g, w2_g)
    return out.reshape(n, c_out, h, w)


if __name__ == "__main__":
    key = jax.random.PRNGKey(0)
    k1, k2, kw1, kw2 = jax.random.split(key, 4)

    # Up(in_ch=8, out_ch=4, bilinear=True): x1 has in_ch//2 = 4 channels at
    # half resolution, x2 has 4 channels at full resolution; mid = in_ch//2.
    N, C_half, H, W = 2, 4, 16, 16
    in_ch, out_ch, mid_ch = 2 * C_half, 4, C_half

    x1 = jax.random.normal(k1, (N, C_half, H // 2, W // 2), jnp.float32)
    x2 = jax.random.normal(k2, (N, C_half, H, W), jnp.float32)
    w_conv1 = jax.random.normal(kw1, (mid_ch, in_ch, 3, 3), jnp.float32) * 0.1
    w_conv2 = jax.random.normal(kw2, (out_ch, mid_ch, 3, 3), jnp.float32) * 0.1

    out = jax.jit(up_forward)(x1, x2, w_conv1, w_conv2)
    out = jax.block_until_ready(out)
    assert out.shape == (N, out_ch, H, W)

    # ---- pure-JAX reference of Up.forward ----
    hi = jax.lax.Precision.HIGHEST
    lh_r = jnp.asarray(_interp_matrix(H // 2, H))
    lw_r = jnp.asarray(_interp_matrix(W // 2, W))
    x1u = jnp.einsum("oh,nchw->ncow", lh_r, x1, precision=hi)
    x1u = jnp.einsum("ncow,pw->ncop", x1u, lw_r, precision=hi)
    xcat = jnp.concatenate([x2, x1u], axis=1)

    def conv_in_relu_ref(x, wgt):
        y = jax.lax.conv_general_dilated(
            x, wgt, window_strides=(1, 1), padding=((1, 1), (1, 1)),
            dimension_numbers=("NCHW", "OIHW", "NCHW"), precision=hi)
        mu = jnp.mean(y, axis=(2, 3), keepdims=True)
        var = jnp.mean((y - mu) ** 2, axis=(2, 3), keepdims=True)
        return jnp.maximum((y - mu) * jax.lax.rsqrt(var + 1e-5), 0.0)

    ref = conv_in_relu_ref(conv_in_relu_ref(xcat, w_conv1), w_conv2)
    err = float(jnp.max(jnp.abs(out - ref)))
    assert jnp.allclose(out, ref, atol=1e-3, rtol=1e-3), err

    print("KERNEL_OK")
</pallas_src>

<mosaic_0001>
module attributes {stable_mosaic.version = 11 : i64} {
  func.func @_up_block_kernel(%arg0: i32, %arg1: memref<1x4x256xf32, #tpu.memory_space<vmem>>, %arg2: memref<1x4x8x8xf32, #tpu.memory_space<vmem>>, %arg3: memref<16x8xf32, #tpu.memory_space<vmem>>, %arg4: memref<8x16xf32, #tpu.memory_space<vmem>>, %arg5: memref<3x1x256xf32, #tpu.memory_space<vmem>>, %arg6: memref<4x72xf32, #tpu.memory_space<vmem>>, %arg7: memref<4x36xf32, #tpu.memory_space<vmem>>, %arg8: memref<1x4x256xf32, #tpu.memory_space<vmem>>, %arg9: memref<8x401xf32, #tpu.memory_space<vmem>>, %arg10: memref<72x256xf32, #tpu.memory_space<vmem>>, %arg11: memref<64x16xf32, #tpu.memory_space<vmem>>) attributes {dimension_semantics = [#tpu.dimension_semantics<parallel>], iteration_bounds = array<i64: 2>, scalar_prefetch = 0 : i64, scratch_operands = 3 : i64, tpu.core_type = #tpu.core_type<tc>, window_params = [{transform_indices = @transform_0, window_bounds = array<i64: 1, 4, 256>}, {transform_indices = @transform_1, window_bounds = array<i64: 1, 4, 8, 8>}, {pipeline_mode = #tpu.pipeline_mode<synchronous>, transform_indices = @transform_2, window_bounds = array<i64: 16, 8>}, {pipeline_mode = #tpu.pipeline_mode<synchronous>, transform_indices = @transform_3, window_bounds = array<i64: 8, 16>}, {pipeline_mode = #tpu.pipeline_mode<synchronous>, transform_indices = @transform_4, window_bounds = array<i64: 3, 1, 256>}, {pipeline_mode = #tpu.pipeline_mode<synchronous>, transform_indices = @transform_5, window_bounds = array<i64: 4, 72>}, {pipeline_mode = #tpu.pipeline_mode<synchronous>, transform_indices = @transform_6, window_bounds = array<i64: 4, 36>}, {transform_indices = @transform_7, window_bounds = array<i64: 1, 4, 256>}]} {
    %cst = arith.constant 0.000000e+00 : f32
    %0 = vector.broadcast %cst : f32 to vector<8x128xf32>
    %c0 = arith.constant 0 : index
    %c0_0 = arith.constant 0 : index
    %1 = vector.load %arg9[%c0, %c0_0] : memref<8x401xf32, #tpu.memory_space<vmem>>, vector<8x128xf32>
    tpu.vector_store %arg9[%c0, %c0_0], %0 {strides = array<i32>} : memref<8x401xf32, #tpu.memory_space<vmem>>, vector<8x128xf32>,
    %cst_1 = arith.constant 0.000000e+00 : f32
    %2 = vector.broadcast %cst_1 : f32 to vector<8x17xf32>
    %c0_2 = arith.constant 0 : index
    %c384 = arith.constant 384 : index
    %3 = vector.load %arg9[%c0_2, %c384] : memref<8x401xf32, #tpu.memory_space<vmem>>, vector<8x17xf32>
    tpu.vector_store %arg9[%c0_2, %c384], %2 {strides = array<i32>} : memref<8x401xf32, #tpu.memory_space<vmem>>, vector<8x17xf32>,
    %c0_3 = arith.constant 0 : index
    %c0_4 = arith.constant 0 : index
    %4 = vector.load %arg3[%c0_3, %c0_4] : memref<16x8xf32, #tpu.memory_space<vmem>>, vector<16x8xf32>
    %c0_5 = arith.constant 0 : index
    %c0_6 = arith.constant 0 : index
    %c0_7 = arith.constant 0 : index
    %c0_8 = arith.constant 0 : index
    %5 = vector.load %arg2[%c0_5, %c0_6, %c0_7, %c0_8] : memref<1x4x8x8xf32, #tpu.memory_space<vmem>>, vector<1x1x8x8xf32>
    %6 = vector.shape_cast %5 : vector<1x1x8x8xf32> to vector<8x8xf32>
    %cst_9 = arith.constant dense<0.000000e+00> : vector<16x8xf32>
    %7 = tpu.matmul %4, %6, %cst_9 {dimension_numbers = #tpu.dot_dimension_numbers<[1], [0], [0], [1], [0, 0, 1, 1], [], []>} : vector<16x8xf32>, vector<8x8xf32>, vector<16x8xf32> -> vector<16x8xf32>
    %c0_10 = arith.constant 0 : index
    %c0_11 = arith.constant 0 : index
    %8 = vector.load %arg4[%c0_10, %c0_11] : memref<8x16xf32, #tpu.memory_space<vmem>>, vector<8x16xf32>
    %cst_12 = arith.constant dense<0.000000e+00> : vector<16x16xf32>
    %9 = tpu.matmul %7, %8, %cst_12 {dimension_numbers = #tpu.dot_dimension_numbers<[1], [0], [0], [1], [0, 0, 1, 1], [], []>} : vector<16x8xf32>, vector<8x16xf32>, vector<16x16xf32> -> vector<16x16xf32>
    %c0_13 = arith.constant 0 : index
    %c0_14 = arith.constant 0 : index
    %10 = vector.load %arg11[%c0_13, %c0_14] : memref<64x16xf32, #tpu.memory_space<vmem>>, vector<16x16xf32>
    tpu.vector_store %arg11[%c0_13, %c0_14], %9 {strides = array<i32>} : memref<64x16xf32, #tpu.memory_space<vmem>>, vector<16x16xf32>,
    %c0_15 = arith.constant 0 : index
    %c0_16 = arith.constant 0 : index
    %11 = vector.load %arg3[%c0_15, %c0_16] : memref<16x8xf32, #tpu.memory_space<vmem>>, vector<16x8xf32>
    %c0_17 = arith.constant 0 : index
    %c1 = arith.constant 1 : index
    %c0_18 = arith.constant 0 : index
    %c0_19 = arith.constant 0 : index
    %12 = vector.load %arg2[%c0_17, %c1, %c0_18, %c0_19] : memref<1x4x8x8xf32, #tpu.memory_space<vmem>>, vector<1x1x8x8xf32>
    %13 = vector.shape_cast %12 : vector<1x1x8x8xf32> to vector<8x8xf32>
    %cst_20 = arith.constant dense<0.000000e+00> : vector<16x8xf32>
    %14 = tpu.matmul %11, %13, %cst_20 {dimension_numbers = #tpu.dot_dimension_numbers<[1], [0], [0], [1], [0, 0, 1, 1], [], []>} : vector<16x8xf32>, vector<8x8xf32>, vector<16x8xf32> -> vector<16x8xf32>
    %c0_21 = arith.constant 0 : index
    %c0_22 = arith.constant 0 : index
    %15 = vector.load %arg4[%c0_21, %c0_22] : memref<8x16xf32, #tpu.memory_space<vmem>>, vector<8x16xf32>
    %cst_23 = arith.constant dense<0.000000e+00> : vector<16x16xf32>
    %16 = tpu.matmul %14, %15, %cst_23 {dimension_numbers = #tpu.dot_dimension_numbers<[1], [0], [0], [1], [0, 0, 1, 1], [], []>} : vector<16x8xf32>, vector<8x16xf32>, vector<16x16xf32> -> vector<16x16xf32>
    %c16 = arith.constant 16 : index
    %c0_24 = arith.constant 0 : index
    %17 = vector.load %arg11[%c16, %c0_24] : memref<64x16xf32, #tpu.memory_space<vmem>>, vector<16x16xf32>
    tpu.vector_store %arg11[%c16, %c0_24], %16 {strides = array<i32>} : memref<64x16xf32, #tpu.memory_space<vmem>>, vector<16x16xf32>,
    %c0_25 = arith.constant 0 : index
    %c0_26 = arith.constant 0 : index
    %18 = vector.load %arg3[%c0_25, %c0_26] : memref<16x8xf32, #tpu.memory_space<vmem>>, vector<16x8xf32>
    %c0_27 = arith.constant 0 : index
    %c2 = arith.constant 2 : index
    %c0_28 = arith.constant 0 : index
    %c0_29 = arith.constant 0 : index
    %19 = vector.load %arg2[%c0_27, %c2, %c0_28, %c0_29] : memref<1x4x8x8xf32, #tpu.memory_space<vmem>>, vector<1x1x8x8xf32>
    %20 = vector.shape_cast %19 : vector<1x1x8x8xf32> to vector<8x8xf32>
    %cst_30 = arith.constant dense<0.000000e+00> : vector<16x8xf32>
    %21 = tpu.matmul %18, %20, %cst_30 {dimension_numbers = #tpu.dot_dimension_numbers<[1], [0], [0], [1], [0, 0, 1, 1], [], []>} : vector<16x8xf32>, vector<8x8xf32>, vector<16x8xf32> -> vector<16x8xf32>
    %c0_31 = arith.constant 0 : index
    %c0_32 = arith.constant 0 : index
    %22 = vector.load %arg4[%c0_31, %c0_32] : memref<8x16xf32, #tpu.memory_space<vmem>>, vector<8x16xf32>
    %cst_33 = arith.constant dense<0.000000e+00> : vector<16x16xf32>
    %23 = tpu.matmul %21, %22, %cst_33 {dimension_numbers = #tpu.dot_dimension_numbers<[1], [0], [0], [1], [0, 0, 1, 1], [], []>} : vector<16x8xf32>, vector<8x16xf32>, vector<16x16xf32> -> vector<16x16xf32>
    %c32 = arith.constant 32 : index
    %c0_34 = arith.constant 0 : index
    %24 = vector.load %arg11[%c32, %c0_34] : memref<64x16xf32, #tpu.memory_space<vmem>>, vector<16x16xf32>
    tpu.vector_store %arg11[%c32, %c0_34], %23 {strides = array<i32>} : memref<64x16xf32, #tpu.memory_space<vmem>>, vector<16x16xf32>,
    %c0_35 = arith.constant 0 : index
    %c0_36 = arith.constant 0 : index
    %25 = vector.load %arg3[%c0_35, %c0_36] : memref<16x8xf32, #tpu.memory_space<vmem>>, vector<16x8xf32>
    %c0_37 = arith.constant 0 : index
    %c3 = arith.constant 3 : index
    %c0_38 = arith.constant 0 : index
    %c0_39 = arith.constant 0 : index
    %26 = vector.load %arg2[%c0_37, %c3, %c0_38, %c0_39] : memref<1x4x8x8xf32, #tpu.memory_space<vmem>>, vector<1x1x8x8xf32>
    %27 = vector.shape_cast %26 : vector<1x1x8x8xf32> to vector<8x8xf32>
    %cst_40 = arith.constant dense<0.000000e+00> : vector<16x8xf32>
    %28 = tpu.matmul %25, %27, %cst_40 {dimension_numbers = #tpu.dot_dimension_numbers<[1], [0], [0], [1], [0, 0, 1, 1], [], []>} : vector<16x8xf32>, vector<8x8xf32>, vector<16x8xf32> -> vector<16x8xf32>
    %c0_41 = arith.constant 0 : index
    %c0_42 = arith.constant 0 : index
    %29 = vector.load %arg4[%c0_41, %c0_42] : memref<8x16xf32, #tpu.memory_space<vmem>>, vector<8x16xf32>
    %cst_43 = arith.constant dense<0.000000e+00> : vector<16x16xf32>
    %30 = tpu.matmul %28, %29, %cst_43 {dimension_numbers = #tpu.dot_dimension_numbers<[1], [0], [0], [1], [0, 0, 1, 1], [], []>} : vector<16x8xf32>, vector<8x16xf32>, vector<16x16xf32> -> vector<16x16xf32>
    %c48 = arith.constant 48 : index
    %c0_44 = arith.constant 0 : index
    %31 = vector.load %arg11[%c48, %c0_44] : memref<64x16xf32, #tpu.memory_space<vmem>>, vector<16x16xf32>
    tpu.vector_store %arg11[%c48, %c0_44], %30 {strides = array<i32>} : memref<64x16xf32, #tpu.memory_space<vmem>>, vector<16x16xf32>,
    %c0_45 = arith.constant 0 : index
    %c0_46 = arith.constant 0 : index
    %c0_47 = arith.constant 0 : index
    %32 = vector.load %arg1[%c0_45, %c0_46, %c0_47] : memref<1x4x256xf32, #tpu.memory_space<vmem>>, vector<1x4x256xf32>
    %33 = vector.shape_cast %32 : vector<1x4x256xf32> to vector<4x256xf32>
    %c0_48 = arith.constant 0 : index
    %c128 = arith.constant 128 : index
    %34 = vector.load %arg9[%c0_48, %c128] : memref<8x401xf32, #tpu.memory_space<vmem>>, vector<4x256xf32>
    tpu.vector_store %arg9[%c0_48, %c128], %33 {strides = array<i32>} : memref<8x401xf32, #tpu.memory_space<vmem>>, vector<4x256xf32>,
    %c0_49 = arith.constant 0 : index
    %c0_50 = arith.constant 0 : index
    %35 = vector.load %arg11[%c0_49, %c0_50] : memref<64x16xf32, #tpu.memory_space<vmem>>, vector<1x16xf32>
    %c4 = arith.constant 4 : index
    %c128_51 = arith.constant 128 : index
    %36 = vector.load %arg9[%c4, %c128_51] : memref<8x401xf32, #tpu.memory_space<vmem>>, vector<1x16xf32>
    tpu.vector_store %arg9[%c4, %c128_51], %35 {strides = array<i32>} : memref<8x401xf32, #tpu.memory_space<vmem>>, vector<1x16xf32>,
    %c1_52 = arith.constant 1 : index
    %c0_53 = arith.constant 0 : index
    %37 = vector.load %arg11[%c1_52, %c0_53] : memref<64x16xf32, #tpu.memory_space<vmem>>, vector<1x16xf32>
    %c4_54 = arith.constant 4 : index
    %c144 = arith.constant 144 : index
    %38 = vector.load %arg9[%c4_54, %c144] : memref<8x401xf32, #tpu.memory_space<vmem>>, vector<1x16xf32>
    tpu.vector_store %arg9[%c4_54, %c144], %37 {strides = array<i32>} : memref<8x401xf32, #tpu.memory_space<vmem>>, vector<1x16xf32>,
    %c2_55 = arith.constant 2 : index
    %c0_56 = arith.constant 0 : index
    %39 = vector.load %arg11[%c2_55, %c0_56] : memref<64x16xf32, #tpu.memory_space<vmem>>, vector<1x16xf32>
    %c4_57 = arith.constant 4 : index
    %c160 = arith.constant 160 : index
    %40 = vector.load %arg9[%c4_57, %c160] : memref<8x401xf32, #tpu.memory_space<vmem>>, vector<1x16xf32>
    tpu.vector_store %arg9[%c4_57, %c160], %39 {strides = array<i32>} : memref<8x401xf32, #tpu.memory_space<vmem>>, vector<1x16xf32>,
    %c3_58 = arith.constant 3 : index
    %c0_59 = arith.constant 0 : index
    %41 = vector.load %arg11[%c3_58, %c0_59] : memref<64x16xf32, #tpu.memory_space<vmem>>, vector<1x16xf32>
    %c4_60 = arith.constant 4 : index
    %c176 = arith.constant 176 : index
    %42 = vector.load %arg9[%c4_60, %c176] : memref<8x401xf32, #tpu.memory_space<vmem>>, vector<1x16xf32>
    tpu.vector_store %arg9[%c4_60, %c176], %41 {strides = array<i32>} : memref<8x401xf32, #tpu.memory_space<vmem>>, vector<1x16xf32>,
    %c4_61 = arith.constant 4 : index
    %c0_62 = arith.constant 0 : index
    %43 = vector.load %arg11[%c4_61, %c0_62] : memref<64x16xf32, #tpu.memory_space<vmem>>, vector<1x16xf32>
    %c4_63 = arith.constant 4 : index
    %c192 = arith.constant 192 : index
    %44 = vector.load %arg9[%c4_63, %c192] : memref<8x401xf32, #tpu.memory_space<vmem>>, vector<1x16xf32>
    tpu.vector_store %arg9[%c4_63, %c192], %43 {strides = array<i32>} : memref<8x401xf32, #tpu.memory_space<vmem>>, vector<1x16xf32>,
    %c5 = arith.constant 5 : index
    %c0_64 = arith.constant 0 : index
    %45 = vector.load %arg11[%c5, %c0_64] : memref<64x16xf32, #tpu.memory_space<vmem>>, vector<1x16xf32>
    %c4_65 = arith.constant 4 : index
    %c208 = arith.constant 208 : index
    %46 = vector.load %arg9[%c4_65, %c208] : memref<8x401xf32, #tpu.memory_space<vmem>>, vector<1x16xf32>
    tpu.vector_store %arg9[%c4_65, %c208], %45 {strides = array<i32>} : memref<8x401xf32, #tpu.memory_space<vmem>>, vector<1x16xf32>,
    %c6 = arith.constant 6 : index
    %c0_66 = arith.constant 0 : index
    %47 = vector.load %arg11[%c6, %c0_66] : memref<64x16xf32, #tpu.memory_space<vmem>>, vector<1x16xf32>
    %c4_67 = arith.constant 4 : index
    %c224 = arith.constant 224 : index
    %48 = vector.load %arg9[%c4_67, %c224] : memref<8x401xf32, #tpu.memory_space<vmem>>, vector<1x16xf32>
    tpu.vector_store %arg9[%c4_67, %c224], %47 {strides = array<i32>} : memref<8x401xf32, #tpu.memory_space<vmem>>, vector<1x16xf32>,
    %c7 = arith.constant 7 : index
    %c0_68 = arith.constant 0 : index
    %49 = vector.load %arg11[%c7, %c0_68] : memref<64x16xf32, #tpu.memory_space<vmem>>, vector<1x16xf32>
    %c4_69 = arith.constant 4 : index
    %c240 = arith.constant 240 : index
    %50 = vector.load %arg9[%c4_69, %c240] : memref<8x401xf32, #tpu.memory_space<vmem>>, vector<1x16xf32>
    tpu.vector_store %arg9[%c4_69, %c240], %49 {strides = array<i32>} : memref<8x401xf32, #tpu.memory_space<vmem>>, vector<1x16xf32>,
    %c8 = arith.constant 8 : index
    %c0_70 = arith.constant 0 : index
    %51 = vector.load %arg11[%c8, %c0_70] : memref<64x16xf32, #tpu.memory_space<vmem>>, vector<1x16xf32>
    %c4_71 = arith.constant 4 : index
    %c256 = arith.constant 256 : index
    %52 = vector.load %arg9[%c4_71, %c256] : memref<8x401xf32, #tpu.memory_space<vmem>>, vector<1x16xf32>
    tpu.vector_store %arg9[%c4_71, %c256], %51 {strides = array<i32>} : memref<8x401xf32, #tpu.memory_space<vmem>>, vector<1x16xf32>,
    %c9 = arith.constant 9 : index
    %c0_72 = arith.constant 0 : index
    %53 = vector.load %arg11[%c9, %c0_72] : memref<64x16xf32, #tpu.memory_space<vmem>>, vector<1x16xf32>
    %c4_73 = arith.constant 4 : index
    %c272 = arith.constant 272 : index
    %54 = vector.load %arg9[%c4_73, %c272] : memref<8x401xf32, #tpu.memory_space<vmem>>, vector<1x16xf32>
    tpu.vector_store %arg9[%c4_73, %c272], %53 {strides = array<i32>} : memref<8x401xf32, #tpu.memory_space<vmem>>, vector<1x16xf32>,
    %c10 = arith.constant 10 : index
    %c0_74 = arith.constant 0 : index
    %55 = vector.load %arg11[%c10, %c0_74] : memref<64x16xf32, #tpu.memory_space<vmem>>, vector<1x16xf32>
    %c4_75 = arith.constant 4 : index
    %c288 = arith.constant 288 : index
    %56 = vector.load %arg9[%c4_75, %c288] : memref<8x401xf32, #tpu.memory_space<vmem>>, vector<1x16xf32>
    tpu.vector_store %arg9[%c4_75, %c288], %55 {strides = array<i32>} : memref<8x401xf32, #tpu.memory_space<vmem>>, vector<1x16xf32>,
    %c11 = arith.constant 11 : index
    %c0_76 = arith.constant 0 : index
    %57 = vector.load %arg11[%c11, %c0_76] : memref<64x16xf32, #tpu.memory_space<vmem>>, vector<1x16xf32>
    %c4_77 = arith.constant 4 : index
    %c304 = arith.constant 304 : index
    %58 = vector.load %arg9[%c4_77, %c304] : memref<8x401xf32, #tpu.memory_space<vmem>>, vector<1x16xf32>
    tpu.vector_store %arg9[%c4_77, %c304], %57 {strides = array<i32>} : memref<8x401xf32, #tpu.memory_space<vmem>>, vector<1x16xf32>,
    %c12 = arith.constant 12 : index
    %c0_78 = arith.constant 0 : index
    %59 = vector.load %arg11[%c12, %c0_78] : memref<64x16xf32, #tpu.memory_space<vmem>>, vector<1x16xf32>
    %c4_79 = arith.constant 4 : index
    %c320 = arith.constant 320 : index
    %60 = vector.load %arg9[%c4_79, %c320] : memref<8x401xf32, #tpu.memory_space<vmem>>, vector<1x16xf32>
    tpu.vector_store %arg9[%c4_79, %c320], %59 {strides = array<i32>} : memref<8x401xf32, #tpu.memory_space<vmem>>, vector<1x16xf32>,
    %c13 = arith.constant 13 : index
    %c0_80 = arith.constant 0 : index
    %61 = vector.load %arg11[%c13, %c0_80] : memref<64x16xf32, #tpu.memory_space<vmem>>, vector<1x16xf32>
    %c4_81 = arith.constant 4 : index
    %c336 = arith.constant 336 : index
    %62 = vector.load %arg9[%c4_81, %c336] : memref<8x401xf32, #tpu.memory_space<vmem>>, vector<1x16xf32>
    tpu.vector_store %arg9[%c4_81, %c336], %61 {strides = array<i32>} : memref<8x401xf32, #tpu.memory_space<vmem>>, vector<1x16xf32>,
    %c14 = arith.constant 14 : index
    %c0_82 = arith.constant 0 : index
    %63 = vector.load %arg11[%c14, %c0_82] : memref<64x16xf32, #tpu.memory_space<vmem>>, vector<1x16xf32>
    %c4_83 = arith.constant 4 : index
    %c352 = arith.constant 352 : index
    %64 = vector.load %arg9[%c4_83, %c352] : memref<8x401xf32, #tpu.memory_space<vmem>>, vector<1x16xf32>
    tpu.vector_store %arg9[%c4_83, %c352], %63 {strides = array<i32>} : memref<8x401xf32, #tpu.memory_space<vmem>>, vector<1x16xf32>,
    %c15 = arith.constant 15 : index
    %c0_84 = arith.constant 0 : index
    %65 = vector.load %arg11[%c15, %c0_84] : memref<64x16xf32, #tpu.memory_space<vmem>>, vector<1x16xf32>
    %c4_85 = arith.constant 4 : index
    %c368 = arith.constant 368 : index
    %66 = vector.load %arg9[%c4_85, %c368] : memref<8x401xf32, #tpu.memory_space<vmem>>, vector<1x16xf32>
    tpu.vector_store %arg9[%c4_85, %c368], %65 {strides = array<i32>} : memref<8x401xf32, #tpu.memory_space<vmem>>, vector<1x16xf32>,
    %c16_86 = arith.constant 16 : index
    %c0_87 = arith.constant 0 : index
    %67 = vector.load %arg11[%c16_86, %c0_87] : memref<64x16xf32, #tpu.memory_space<vmem>>, vector<1x16xf32>
    %c5_88 = arith.constant 5 : index
    %c128_89 = arith.constant 128 : index
    %68 = vector.load %arg9[%c5_88, %c128_89] : memref<8x401xf32, #tpu.memory_space<vmem>>, vector<1x16xf32>
    tpu.vector_store %arg9[%c5_88, %c128_89], %67 {strides = array<i32>} : memref<8x401xf32, #tpu.memory_space<vmem>>, vector<1x16xf32>,
    %c17 = arith.constant 17 : index
    %c0_90 = arith.constant 0 : index
    %69 = vector.load %arg11[%c17, %c0_90] : memref<64x16xf32, #tpu.memory_space<vmem>>, vector<1x16xf32>
    %c5_91 = arith.constant 5 : index
    %c144_92 = arith.constant 144 : index
    %70 = vector.load %arg9[%c5_91, %c144_92] : memref<8x401xf32, #tpu.memory_space<vmem>>, vector<1x16xf32>
    tpu.vector_store %arg9[%c5_91, %c144_92], %69 {strides = array<i32>} : memref<8x401xf32, #tpu.memory_space<vmem>>, vector<1x16xf32>,
    %c18 = arith.constant 18 : index
    %c0_93 = arith.constant 0 : index
    %71 = vector.load %arg11[%c18, %c0_93] : memref<64x16xf32, #tpu.memory_space<vmem>>, vector<1x16xf32>
    %c5_94 = arith.constant 5 : index
    %c160_95 = arith.constant 160 : index
    %72 = vector.load %arg9[%c5_94, %c160_95] : memref<8x401xf32, #tpu.memory_space<vmem>>, vector<1x16xf32>
    tpu.vector_store %arg9[%c5_94, %c160_95], %71 {strides = array<i32>} : memref<8x401xf32, #tpu.memory_space<vmem>>, vector<1x16xf32>,
    %c19 = arith.constant 19 : index
    %c0_96 = arith.constant 0 : index
    %73 = vector.load %arg11[%c19, %c0_96] : memref<64x16xf32, #tpu.memory_space<vmem>>, vector<1x16xf32>
    %c5_97 = arith.constant 5 : index
    %c176_98 = arith.constant 176 : index
    %74 = vector.load %arg9[%c5_97, %c176_98] : memref<8x401xf32, #tpu.memory_space<vmem>>, vector<1x16xf32>
    tpu.vector_store %arg9[%c5_97, %c176_98], %73 {strides = array<i32>} : memref<8x401xf32, #tpu.memory_space<vmem>>, vector<1x16xf32>,
    %c20 = arith.constant 20 : index
    %c0_99 = arith.constant 0 : index
    %75 = vector.load %arg11[%c20, %c0_99] : memref<64x16xf32, #tpu.memory_space<vmem>>, vector<1x16xf32>
    %c5_100 = arith.constant 5 : index
    %c192_101 = arith.constant 192 : index
    %76 = vector.load %arg9[%c5_100, %c192_101] : memref<8x401xf32, #tpu.memory_space<vmem>>, vector<1x16xf32>
    tpu.vector_store %arg9[%c5_100, %c192_101], %75 {strides = array<i32>} : memref<8x401xf32, #tpu.memory_space<vmem>>, vector<1x16xf32>,
    %c21 = arith.constant 21 : index
    %c0_102 = arith.constant 0 : index
    %77 = vector.load %arg11[%c21, %c0_102] : memref<64x16xf32, #tpu.memory_space<vmem>>, vector<1x16xf32>
    %c5_103 = arith.constant 5 : index
    %c208_104 = arith.constant 208 : index
    %78 = vector.load %arg9[%c5_103, %c208_104] : memref<8x401xf32, #tpu.memory_space<vmem>>, vector<1x16xf32>
    tpu.vector_store %arg9[%c5_103, %c208_104], %77 {strides = array<i32>} : memref<8x401xf32, #tpu.memory_space<vmem>>, vector<1x16xf32>,
    %c22 = arith.constant 22 : index
    %c0_105 = arith.constant 0 : index
    %79 = vector.load %arg11[%c22, %c0_105] : memref<64x16xf32, #tpu.memory_space<vmem>>, vector<1x16xf32>
    %c5_106 = arith.constant 5 : index
    %c224_107 = arith.constant 224 : index
    %80 = vector.load %arg9[%c5_106, %c224_107] : memref<8x401xf32, #tpu.memory_space<vmem>>, vector<1x16xf32>
    tpu.vector_store %arg9[%c5_106, %c224_107], %79 {strides = array<i32>} : memref<8x401xf32, #tpu.memory_space<vmem>>, vector<1x16xf32>,
    %c23 = arith.constant 23 : index
    %c0_108 = arith.constant 0 : index
    %81 = vector.load %arg11[%c23, %c0_108] : memref<64x16xf32, #tpu.memory_space<vmem>>, vector<1x16xf32>
    %c5_109 = arith.constant 5 : index
    %c240_110 = arith.constant 240 : index
    %82 = vector.load %arg9[%c5_109, %c240_110] : memref<8x401xf32, #tpu.memory_space<vmem>>, vector<1x16xf32>
    tpu.vector_store %arg9[%c5_109, %c240_110], %81 {strides = array<i32>} : memref<8x401xf32, #tpu.memory_space<vmem>>, vector<1x16xf32>,
    %c24 = arith.constant 24 : index
    %c0_111 = arith.constant 0 : index
    %83 = vector.load %arg11[%c24, %c0_111] : memref<64x16xf32, #tpu.memory_space<vmem>>, vector<1x16xf32>
    %c5_112 = arith.constant 5 : index
    %c256_113 = arith.constant 256 : index
    %84 = vector.load %arg9[%c5_112, %c256_113] : memref<8x401xf32, #tpu.memory_space<vmem>>, vector<1x16xf32>
    tpu.vector_store %arg9[%c5_112, %c256_113], %83 {strides = array<i32>} : memref<8x401xf32, #tpu.memory_space<vmem>>, vector<1x16xf32>,
    %c25 = arith.constant 25 : index
    %c0_114 = arith.constant 0 : index
    %85 = vector.load %arg11[%c25, %c0_114] : memref<64x16xf32, #tpu.memory_space<vmem>>, vector<1x16xf32>
    %c5_115 = arith.constant 5 : index
    %c272_116 = arith.constant 272 : index
    %86 = vector.load %arg9[%c5_115, %c272_116] : memref<8x401xf32, #tpu.memory_space<vmem>>, vector<1x16xf32>
    tpu.vector_store %arg9[%c5_115, %c272_116], %85 {strides = array<i32>} : memref<8x401xf32, #tpu.memory_space<vmem>>, vector<1x16xf32>,
    %c26 = arith.constant 26 : index
    %c0_117 = arith.constant 0 : index
    %87 = vector.load %arg11[%c26, %c0_117] : memref<64x16xf32, #tpu.memory_space<vmem>>, vector<1x16xf32>
    %c5_118 = arith.constant 5 : index
    %c288_119 = arith.constant 288 : index
    %88 = vector.load %arg9[%c5_118, %c288_119] : memref<8x401xf32, #tpu.memory_space<vmem>>, vector<1x16xf32>
    tpu.vector_store %arg9[%c5_118, %c288_119], %87 {strides = array<i32>} : memref<8x401xf32, #tpu.memory_space<vmem>>, vector<1x16xf32>,
    %c27 = arith.constant 27 : index
    %c0_120 = arith.constant 0 : index
    %89 = vector.load %arg11[%c27, %c0_120] : memref<64x16xf32, #tpu.memory_space<vmem>>, vector<1x16xf32>
    %c5_121 = arith.constant 5 : index
    %c304_122 = arith.constant 304 : index
    %90 = vector.load %arg9[%c5_121, %c304_122] : memref<8x401xf32, #tpu.memory_space<vmem>>, vector<1x16xf32>
    tpu.vector_store %arg9[%c5_121, %c304_122], %89 {strides = array<i32>} : memref<8x401xf32, #tpu.memory_space<vmem>>, vector<1x16xf32>,
    %c28 = arith.constant 28 : index
    %c0_123 = arith.constant 0 : index
    %91 = vector.load %arg11[%c28, %c0_123] : memref<64x16xf32, #tpu.memory_space<vmem>>, vector<1x16xf32>
    %c5_124 = arith.constant 5 : index
    %c320_125 = arith.constant 320 : index
    %92 = vector.load %arg9[%c5_124, %c320_125] : memref<8x401xf32, #tpu.memory_space<vmem>>, vector<1x16xf32>
    tpu.vector_store %arg9[%c5_124, %c320_125], %91 {strides = array<i32>} : memref<8x401xf32, #tpu.memory_space<vmem>>, vector<1x16xf32>,
    %c29 = arith.constant 29 : index
    %c0_126 = arith.constant 0 : index
    %93 = vector.load %arg11[%c29, %c0_126] : memref<64x16xf32, #tpu.memory_space<vmem>>, vector<1x16xf32>
    %c5_127 = arith.constant 5 : index
    %c336_128 = arith.constant 336 : index
    %94 = vector.load %arg9[%c5_127, %c336_128] : memref<8x401xf32, #tpu.memory_space<vmem>>, vector<1x16xf32>
    tpu.vector_store %arg9[%c5_127, %c336_128], %93 {strides = array<i32>} : memref<8x401xf32, #tpu.memory_space<vmem>>, vector<1x16xf32>,
    %c30 = arith.constant 30 : index
    %c0_129 = arith.constant 0 : index
    %95 = vector.load %arg11[%c30, %c0_129] : memref<64x16xf32, #tpu.memory_space<vmem>>, vector<1x16xf32>
    %c5_130 = arith.constant 5 : index
    %c352_131 = arith.constant 352 : index
    %96 = vector.load %arg9[%c5_130, %c352_131] : memref<8x401xf32, #tpu.memory_space<vmem>>, vector<1x16xf32>
    tpu.vector_store %arg9[%c5_130, %c352_131], %95 {strides = array<i32>} : memref<8x401xf32, #tpu.memory_space<vmem>>, vector<1x16xf32>,
    %c31 = arith.constant 31 : index
    %c0_132 = arith.constant 0 : index
    %97 = vector.load %arg11[%c31, %c0_132] : memref<64x16xf32, #tpu.memory_space<vmem>>, vector<1x16xf32>
    %c5_133 = arith.constant 5 : index
    %c368_134 = arith.constant 368 : index
    %98 = vector.load %arg9[%c5_133, %c368_134] : memref<8x401xf32, #tpu.memory_space<vmem>>, vector<1x16xf32>
    tpu.vector_store %arg9[%c5_133, %c368_134], %97 {strides = array<i32>} : memref<8x401xf32, #tpu.memory_space<vmem>>, vector<1x16xf32>,
    %c32_135 = arith.constant 32 : index
    %c0_136 = arith.constant 0 : index
    %99 = vector.load %arg11[%c32_135, %c0_136] : memref<64x16xf32, #tpu.memory_space<vmem>>, vector<1x16xf32>
    %c6_137 = arith.constant 6 : index
    %c128_138 = arith.constant 128 : index
    %100 = vector.load %arg9[%c6_137, %c128_138] : memref<8x401xf32, #tpu.memory_space<vmem>>, vector<1x16xf32>
    tpu.vector_store %arg9[%c6_137, %c128_138], %99 {strides = array<i32>} : memref<8x401xf32, #tpu.memory_space<vmem>>, vector<1x16xf32>,
    %c33 = arith.constant 33 : index
    %c0_139 = arith.constant 0 : index
    %101 = vector.load %arg11[%c33, %c0_139] : memref<64x16xf32, #tpu.memory_space<vmem>>, vector<1x16xf32>
    %c6_140 = arith.constant 6 : index
    %c144_141 = arith.constant 144 : index
    %102 = vector.load %arg9[%c6_140, %c144_141] : memref<8x401xf32, #tpu.memory_space<vmem>>, vector<1x16xf32>
    tpu.vector_store %arg9[%c6_140, %c144_141], %101 {strides = array<i32>} : memref<8x401xf32, #tpu.memory_space<vmem>>, vector<1x16xf32>,
    %c34 = arith.constant 34 : index
    %c0_142 = arith.constant 0 : index
    %103 = vector.load %arg11[%c34, %c0_142] : memref<64x16xf32, #tpu.memory_space<vmem>>, vector<1x16xf32>
    %c6_143 = arith.constant 6 : index
    %c160_144 = arith.constant 160 : index
    %104 = vector.load %arg9[%c6_143, %c160_144] : memref<8x401xf32, #tpu.memory_space<vmem>>, vector<1x16xf32>
    tpu.vector_store %arg9[%c6_143, %c160_144], %103 {strides = array<i32>} : memref<8x401xf32, #tpu.memory_space<vmem>>, vector<1x16xf32>,
    %c35 = arith.constant 35 : index
    %c0_145 = arith.constant 0 : index
    %105 = vector.load %arg11[%c35, %c0_145] : memref<64x16xf32, #tpu.memory_space<vmem>>, vector<1x16xf32>
    %c6_146 = arith.constant 6 : index
    %c176_147 = arith.constant 176 : index
    %106 = vector.load %arg9[%c6_146, %c176_147] : memref<8x401xf32, #tpu.memory_space<vmem>>, vector<1x16xf32>
    tpu.vector_store %arg9[%c6_146, %c176_147], %105 {strides = array<i32>} : memref<8x401xf32, #tpu.memory_space<vmem>>, vector<1x16xf32>,
    %c36 = arith.constant 36 : index
    %c0_148 = arith.constant 0 : index
    %107 = vector.load %arg11[%c36, %c0_148] : memref<64x16xf32, #tpu.memory_space<vmem>>, vector<1x16xf32>
    %c6_149 = arith.constant 6 : index
    %c192_150 = arith.constant 192 : index
    %108 = vector.load %arg9[%c6_149, %c192_150] : memref<8x401xf32, #tpu.memory_space<vmem>>, vector<1x16xf32>
    tpu.vector_store %arg9[%c6_149, %c192_150], %107 {strides = array<i32>} : memref<8x401xf32, #tpu.memory_space<vmem>>, vector<1x16xf32>,
    %c37 = arith.constant 37 : index
    %c0_151 = arith.constant 0 : index
    %109 = vector.load %arg11[%c37, %c0_151] : memref<64x16xf32, #tpu.memory_space<vmem>>, vector<1x16xf32>
    %c6_152 = arith.constant 6 : index
    %c208_153 = arith.constant 208 : index
    %110 = vector.load %arg9[%c6_152, %c208_153] : memref<8x401xf32, #tpu.memory_space<vmem>>, vector<1x16xf32>
    tpu.vector_store %arg9[%c6_152, %c208_153], %109 {strides = array<i32>} : memref<8x401xf32, #tpu.memory_space<vmem>>, vector<1x16xf32>,
    %c38 = arith.constant 38 : index
    %c0_154 = arith.constant 0 : index
    %111 = vector.load %arg11[%c38, %c0_154] : memref<64x16xf32, #tpu.memory_space<vmem>>, vector<1x16xf32>
    %c6_155 = arith.constant 6 : index
    %c224_156 = arith.constant 224 : index
    %112 = vector.load %arg9[%c6_155, %c224_156] : memref<8x401xf32, #tpu.memory_space<vmem>>, vector<1x16xf32>
    tpu.vector_store %arg9[%c6_155, %c224_156], %111 {strides = array<i32>} : memref<8x401xf32, #tpu.memory_space<vmem>>, vector<1x16xf32>,
    %c39 = arith.constant 39 : index
    %c0_157 = arith.constant 0 : index
    %113 = vector.load %arg11[%c39, %c0_157] : memref<64x16xf32, #tpu.memory_space<vmem>>, vector<1x16xf32>
    %c6_158 = arith.constant 6 : index
    %c240_159 = arith.constant 240 : index
    %114 = vector.load %arg9[%c6_158, %c240_159] : memref<8x401xf32, #tpu.memory_space<vmem>>, vector<1x16xf32>
    tpu.vector_store %arg9[%c6_158, %c240_159], %113 {strides = array<i32>} : memref<8x401xf32, #tpu.memory_space<vmem>>, vector<1x16xf32>,
    %c40 = arith.constant 40 : index
    %c0_160 = arith.constant 0 : index
    %115 = vector.load %arg11[%c40, %c0_160] : memref<64x16xf32, #tpu.memory_space<vmem>>, vector<1x16xf32>
    %c6_161 = arith.constant 6 : index
    %c256_162 = arith.constant 256 : index
    %116 = vector.load %arg9[%c6_161, %c256_162] : memref<8x401xf32, #tpu.memory_space<vmem>>, vector<1x16xf32>
    tpu.vector_store %arg9[%c6_161, %c256_162], %115 {strides = array<i32>} : memref<8x401xf32, #tpu.memory_space<vmem>>, vector<1x16xf32>,
    %c41 = arith.constant 41 : index
    %c0_163 = arith.constant 0 : index
    %117 = vector.load %arg11[%c41, %c0_163] : memref<64x16xf32, #tpu.memory_space<vmem>>, vector<1x16xf32>
    %c6_164 = arith.constant 6 : index
    %c272_165 = arith.constant 272 : index
    %118 = vector.load %arg9[%c6_164, %c272_165] : memref<8x401xf32, #tpu.memory_space<vmem>>, vector<1x16xf32>
    tpu.vector_store %arg9[%c6_164, %c272_165], %117 {strides = array<i32>} : memref<8x401xf32, #tpu.memory_space<vmem>>, vector<1x16xf32>,
    %c42 = arith.constant 42 : index
    %c0_166 = arith.constant 0 : index
    %119 = vector.load %arg11[%c42, %c0_166] : memref<64x16xf32, #tpu.memory_space<vmem>>, vector<1x16xf32>
    %c6_167 = arith.constant 6 : index
    %c288_168 = arith.constant 288 : index
    %120 = vector.load %arg9[%c6_167, %c288_168] : memref<8x401xf32, #tpu.memory_space<vmem>>, vector<1x16xf32>
    tpu.vector_store %arg9[%c6_167, %c288_168], %119 {strides = array<i32>} : memref<8x401xf32, #tpu.memory_space<vmem>>, vector<1x16xf32>,
    %c43 = arith.constant 43 : index
    %c0_169 = arith.constant 0 : index
    %121 = vector.load %arg11[%c43, %c0_169] : memref<64x16xf32, #tpu.memory_space<vmem>>, vector<1x16xf32>
    %c6_170 = arith.constant 6 : index
    %c304_171 = arith.constant 304 : index
    %122 = vector.load %arg9[%c6_170, %c304_171] : memref<8x401xf32, #tpu.memory_space<vmem>>, vector<1x16xf32>
    tpu.vector_store %arg9[%c6_170, %c304_171], %121 {strides = array<i32>} : memref<8x401xf32, #tpu.memory_space<vmem>>, vector<1x16xf32>,
    %c44 = arith.constant 44 : index
    %c0_172 = arith.constant 0 : index
    %123 = vector.load %arg11[%c44, %c0_172] : memref<64x16xf32, #tpu.memory_space<vmem>>, vector<1x16xf32>
    %c6_173 = arith.constant 6 : index
    %c320_174 = arith.constant 320 : index
    %124 = vector.load %arg9[%c6_173, %c320_174] : memref<8x401xf32, #tpu.memory_space<vmem>>, vector<1x16xf32>
    tpu.vector_store %arg9[%c6_173, %c320_174], %123 {strides = array<i32>} : memref<8x401xf32, #tpu.memory_space<vmem>>, vector<1x16xf32>,
    %c45 = arith.constant 45 : index
    %c0_175 = arith.constant 0 : index
    %125 = vector.load %arg11[%c45, %c0_175] : memref<64x16xf32, #tpu.memory_space<vmem>>, vector<1x16xf32>
    %c6_176 = arith.constant 6 : index
    %c336_177 = arith.constant 336 : index
    %126 = vector.load %arg9[%c6_176, %c336_177] : memref<8x401xf32, #tpu.memory_space<vmem>>, vector<1x16xf32>
    tpu.vector_store %arg9[%c6_176, %c336_177], %125 {strides = array<i32>} : memref<8x401xf32, #tpu.memory_space<vmem>>, vector<1x16xf32>,
    %c46 = arith.constant 46 : index
    %c0_178 = arith.constant 0 : index
    %127 = vector.load %arg11[%c46, %c0_178] : memref<64x16xf32, #tpu.memory_space<vmem>>, vector<1x16xf32>
    %c6_179 = arith.constant 6 : index
    %c352_180 = arith.constant 352 : index
    %128 = vector.load %arg9[%c6_179, %c352_180] : memref<8x401xf32, #tpu.memory_space<vmem>>, vector<1x16xf32>
    tpu.vector_store %arg9[%c6_179, %c352_180], %127 {strides = array<i32>} : memref<8x401xf32, #tpu.memory_space<vmem>>, vector<1x16xf32>,
    %c47 = arith.constant 47 : index
    %c0_181 = arith.constant 0 : index
    %129 = vector.load %arg11[%c47, %c0_181] : memref<64x16xf32, #tpu.memory_space<vmem>>, vector<1x16xf32>
    %c6_182 = arith.constant 6 : index
    %c368_183 = arith.constant 368 : index
    %130 = vector.load %arg9[%c6_182, %c368_183] : memref<8x401xf32, #tpu.memory_space<vmem>>, vector<1x16xf32>
    tpu.vector_store %arg9[%c6_182, %c368_183], %129 {strides = array<i32>} : memref<8x401xf32, #tpu.memory_space<vmem>>, vector<1x16xf32>,
    %c48_184 = arith.constant 48 : index
    %c0_185 = arith.constant 0 : index
    %131 = vector.load %arg11[%c48_184, %c0_185] : memref<64x16xf32, #tpu.memory_space<vmem>>, vector<1x16xf32>
    %c7_186 = arith.constant 7 : index
    %c128_187 = arith.constant 128 : index
    %132 = vector.load %arg9[%c7_186, %c128_187] : memref<8x401xf32, #tpu.memory_space<vmem>>, vector<1x16xf32>
    tpu.vector_store %arg9[%c7_186, %c128_187], %131 {strides = array<i32>} : memref<8x401xf32, #tpu.memory_space<vmem>>, vector<1x16xf32>,
    %c49 = arith.constant 49 : index
    %c0_188 = arith.constant 0 : index
    %133 = vector.load %arg11[%c49, %c0_188] : memref<64x16xf32, #tpu.memory_space<vmem>>, vector<1x16xf32>
    %c7_189 = arith.constant 7 : index
    %c144_190 = arith.constant 144 : index
    %134 = vector.load %arg9[%c7_189, %c144_190] : memref<8x401xf32, #tpu.memory_space<vmem>>, vector<1x16xf32>
    tpu.vector_store %arg9[%c7_189, %c144_190], %133 {strides = array<i32>} : memref<8x401xf32, #tpu.memory_space<vmem>>, vector<1x16xf32>,
    %c50 = arith.constant 50 : index
    %c0_191 = arith.constant 0 : index
    %135 = vector.load %arg11[%c50, %c0_191] : memref<64x16xf32, #tpu.memory_space<vmem>>, vector<1x16xf32>
    %c7_192 = arith.constant 7 : index
    %c160_193 = arith.constant 160 : index
    %136 = vector.load %arg9[%c7_192, %c160_193] : memref<8x401xf32, #tpu.memory_space<vmem>>, vector<1x16xf32>
    tpu.vector_store %arg9[%c7_192, %c160_193], %135 {strides = array<i32>} : memref<8x401xf32, #tpu.memory_space<vmem>>, vector<1x16xf32>,
    %c51 = arith.constant 51 : index
    %c0_194 = arith.constant 0 : index
    %137 = vector.load %arg11[%c51, %c0_194] : memref<64x16xf32, #tpu.memory_space<vmem>>, vector<1x16xf32>
    %c7_195 = arith.constant 7 : index
    %c176_196 = arith.constant 176 : index
    %138 = vector.load %arg9[%c7_195, %c176_196] : memref<8x401xf32, #tpu.memory_space<vmem>>, vector<1x16xf32>
    tpu.vector_store %arg9[%c7_195, %c176_196], %137 {strides = array<i32>} : memref<8x401xf32, #tpu.memory_space<vmem>>, vector<1x16xf32>,
    %c52 = arith.constant 52 : index
    %c0_197 = arith.constant 0 : index
    %139 = vector.load %arg11[%c52, %c0_197] : memref<64x16xf32, #tpu.memory_space<vmem>>, vector<1x16xf32>
    %c7_198 = arith.constant 7 : index
    %c192_199 = arith.constant 192 : index
    %140 = vector.load %arg9[%c7_198, %c192_199] : memref<8x401xf32, #tpu.memory_space<vmem>>, vector<1x16xf32>
    tpu.vector_store %arg9[%c7_198, %c192_199], %139 {strides = array<i32>} : memref<8x401xf32, #tpu.memory_space<vmem>>, vector<1x16xf32>,
    %c53 = arith.constant 53 : index
    %c0_200 = arith.constant 0 : index
    %141 = vector.load %arg11[%c53, %c0_200] : memref<64x16xf32, #tpu.memory_space<vmem>>, vector<1x16xf32>
    %c7_201 = arith.constant 7 : index
    %c208_202 = arith.constant 208 : index
    %142 = vector.load %arg9[%c7_201, %c208_202] : memref<8x401xf32, #tpu.memory_space<vmem>>, vector<1x16xf32>
    tpu.vector_store %arg9[%c7_201, %c208_202], %141 {strides = array<i32>} : memref<8x401xf32, #tpu.memory_space<vmem>>, vector<1x16xf32>,
    %c54 = arith.constant 54 : index
    %c0_203 = arith.constant 0 : index
    %143 = vector.load %arg11[%c54, %c0_203] : memref<64x16xf32, #tpu.memory_space<vmem>>, vector<1x16xf32>
    %c7_204 = arith.constant 7 : index
    %c224_205 = arith.constant 224 : index
    %144 = vector.load %arg9[%c7_204, %c224_205] : memref<8x401xf32, #tpu.memory_space<vmem>>, vector<1x16xf32>
    tpu.vector_store %arg9[%c7_204, %c224_205], %143 {strides = array<i32>} : memref<8x401xf32, #tpu.memory_space<vmem>>, vector<1x16xf32>,
    %c55 = arith.constant 55 : index
    %c0_206 = arith.constant 0 : index
    %145 = vector.load %arg11[%c55, %c0_206] : memref<64x16xf32, #tpu.memory_space<vmem>>, vector<1x16xf32>
    %c7_207 = arith.constant 7 : index
    %c240_208 = arith.constant 240 : index
    %146 = vector.load %arg9[%c7_207, %c240_208] : memref<8x401xf32, #tpu.memory_space<vmem>>, vector<1x16xf32>
    tpu.vector_store %arg9[%c7_207, %c240_208], %145 {strides = array<i32>} : memref<8x401xf32, #tpu.memory_space<vmem>>, vector<1x16xf32>,
    %c56 = arith.constant 56 : index
    %c0_209 = arith.constant 0 : index
    %147 = vector.load %arg11[%c56, %c0_209] : memref<64x16xf32, #tpu.memory_space<vmem>>, vector<1x16xf32>
    %c7_210 = arith.constant 7 : index
    %c256_211 = arith.constant 256 : index
    %148 = vector.load %arg9[%c7_210, %c256_211] : memref<8x401xf32, #tpu.memory_space<vmem>>, vector<1x16xf32>
    tpu.vector_store %arg9[%c7_210, %c256_211], %147 {strides = array<i32>} : memref<8x401xf32, #tpu.memory_space<vmem>>, vector<1x16xf32>,
    %c57 = arith.constant 57 : index
    %c0_212 = arith.constant 0 : index
    %149 = vector.load %arg11[%c57, %c0_212] : memref<64x16xf32, #tpu.memory_space<vmem>>, vector<1x16xf32>
    %c7_213 = arith.constant 7 : index
    %c272_214 = arith.constant 272 : index
    %150 = vector.load %arg9[%c7_213, %c272_214] : memref<8x401xf32, #tpu.memory_space<vmem>>, vector<1x16xf32>
    tpu.vector_store %arg9[%c7_213, %c272_214], %149 {strides = array<i32>} : memref<8x401xf32, #tpu.memory_space<vmem>>, vector<1x16xf32>,
    %c58 = arith.constant 58 : index
    %c0_215 = arith.constant 0 : index
    %151 = vector.load %arg11[%c58, %c0_215] : memref<64x16xf32, #tpu.memory_space<vmem>>, vector<1x16xf32>
    %c7_216 = arith.constant 7 : index
    %c288_217 = arith.constant 288 : index
    %152 = vector.load %arg9[%c7_216, %c288_217] : memref<8x401xf32, #tpu.memory_space<vmem>>, vector<1x16xf32>
    tpu.vector_store %arg9[%c7_216, %c288_217], %151 {strides = array<i32>} : memref<8x401xf32, #tpu.memory_space<vmem>>, vector<1x16xf32>,
    %c59 = arith.constant 59 : index
    %c0_218 = arith.constant 0 : index
    %153 = vector.load %arg11[%c59, %c0_218] : memref<64x16xf32, #tpu.memory_space<vmem>>, vector<1x16xf32>
    %c7_219 = arith.constant 7 : index
    %c304_220 = arith.constant 304 : index
    %154 = vector.load %arg9[%c7_219, %c304_220] : memref<8x401xf32, #tpu.memory_space<vmem>>, vector<1x16xf32>
    tpu.vector_store %arg9[%c7_219, %c304_220], %153 {strides = array<i32>} : memref<8x401xf32, #tpu.memory_space<vmem>>, vector<1x16xf32>,
    %c60 = arith.constant 60 : index
    %c0_221 = arith.constant 0 : index
    %155 = vector.load %arg11[%c60, %c0_221] : memref<64x16xf32, #tpu.memory_space<vmem>>, vector<1x16xf32>
    %c7_222 = arith.constant 7 : index
    %c320_223 = arith.constant 320 : index
    %156 = vector.load %arg9[%c7_222, %c320_223] : memref<8x401xf32, #tpu.memory_space<vmem>>, vector<1x16xf32>
    tpu.vector_store %arg9[%c7_222, %c320_223], %155 {strides = array<i32>} : memref<8x401xf32, #tpu.memory_space<vmem>>, vector<1x16xf32>,
    %c61 = arith.constant 61 : index
    %c0_224 = arith.constant 0 : index
    %157 = vector.load %arg11[%c61, %c0_224] : memref<64x16xf32, #tpu.memory_space<vmem>>, vector<1x16xf32>
    %c7_225 = arith.constant 7 : index
    %c336_226 = arith.constant 336 : index
    %158 = vector.load %arg9[%c7_225, %c336_226] : memref<8x401xf32, #tpu.memory_space<vmem>>, vector<1x16xf32>
    tpu.vector_store %arg9[%c7_225, %c336_226], %157 {strides = array<i32>} : memref<8x401xf32, #tpu.memory_space<vmem>>, vector<1x16xf32>,
    %c62 = arith.constant 62 : index
    %c0_227 = arith.constant 0 : index
    %159 = vector.load %arg11[%c62, %c0_227] : memref<64x16xf32, #tpu.memory_space<vmem>>, vector<1x16xf32>
    %c7_228 = arith.constant 7 : index
    %c352_229 = arith.constant 352 : index
    %160 = vector.load %arg9[%c7_228, %c352_229] : memref<8x401xf32, #tpu.memory_space<vmem>>, vector<1x16xf32>
    tpu.vector_store %arg9[%c7_228, %c352_229], %159 {strides = array<i32>} : memref<8x401xf32, #tpu.memory_space<vmem>>, vector<1x16xf32>,
    %c63 = arith.constant 63 : index
    %c0_230 = arith.constant 0 : index
    %161 = vector.load %arg11[%c63, %c0_230] : memref<64x16xf32, #tpu.memory_space<vmem>>, vector<1x16xf32>
    %c7_231 = arith.constant 7 : index
    %c368_232 = arith.constant 368 : index
    %162 = vector.load %arg9[%c7_231, %c368_232] : memref<8x401xf32, #tpu.memory_space<vmem>>, vector<1x16xf32>
    tpu.vector_store %arg9[%c7_231, %c368_232], %161 {strides = array<i32>} : memref<8x401xf32, #tpu.memory_space<vmem>>, vector<1x16xf32>,
    %c0_233 = arith.constant 0 : index
    %c111 = arith.constant 111 : index
    %163 = vector.load %arg9[%c0_233, %c111] : memref<8x401xf32, #tpu.memory_space<vmem>>, vector<8x256xf32>
    %c0_234 = arith.constant 0 : index
    %c0_235 = arith.constant 0 : index
    %c0_236 = arith.constant 0 : index
    %164 = vector.load %arg5[%c0_234, %c0_235, %c0_236] : memref<3x1x256xf32, #tpu.memory_space<vmem>>, vector<1x1x256xf32>
    %165 = vector.shape_cast %164 : vector<1x1x256xf32> to vector<1x256xf32>
    %166 = vector.broadcast %165 : vector<1x256xf32> to vector<8x256xf32>
    %167 = arith.mulf %163, %166 : vector<8x256xf32>
    %c0_237 = arith.constant 0 : index
    %c0_238 = arith.constant 0 : index
    %168 = vector.load %arg10[%c0_237, %c0_238] : memref<72x256xf32, #tpu.memory_space<vmem>>, vector<8x256xf32>
    tpu.vector_store %arg10[%c0_237, %c0_238], %167 {strides = array<i32>} : memref<72x256xf32, #tpu.memory_space<vmem>>, vector<8x256xf32>,
    %c0_239 = arith.constant 0 : index
    %c112 = arith.constant 112 : index
    %169 = vector.load %arg9[%c0_239, %c112] : memref<8x401xf32, #tpu.memory_space<vmem>>, vector<8x256xf32>
    %c8_240 = arith.constant 8 : index
    %c0_241 = arith.constant 0 : index
    %170 = vector.load %arg10[%c8_240, %c0_241] : memref<72x256xf32, #tpu.memory_space<vmem>>, vector<8x256xf32>
    tpu.vector_store %arg10[%c8_240, %c0_241], %169 {strides = array<i32>} : memref<72x256xf32, #tpu.memory_space<vmem>>, vector<8x256xf32>,
    %c0_242 = arith.constant 0 : index
    %c113 = arith.constant 113 : index
    %171 = vector.load %arg9[%c0_242, %c113] : memref<8x401xf32, #tpu.memory_space<vmem>>, vector<8x256xf32>
    %c2_243 = arith.constant 2 : index
    %c0_244 = arith.constant 0 : index
    %c0_245 = arith.constant 0 : index
    %172 = vector.load %arg5[%c2_243, %c0_244, %c0_245] : memref<3x1x256xf32, #tpu.memory_space<vmem>>, vector<1x1x256xf32>
    %173 = vector.shape_cast %172 : vector<1x1x256xf32> to vector<1x256xf32>
    %174 = vector.broadcast %173 : vector<1x256xf32> to vector<8x256xf32>
    %175 = arith.mulf %171, %174 : vector<8x256xf32>
    %c16_246 = arith.constant 16 : index
    %c0_247 = arith.constant 0 : index
    %176 = vector.load %arg10[%c16_246, %c0_247] : memref<72x256xf32, #tpu.memory_space<vmem>>, vector<8x256xf32>
    tpu.vector_store %arg10[%c16_246, %c0_247], %175 {strides = array<i32>} : memref<72x256xf32, #tpu.memory_space<vmem>>, vector<8x256xf32>,
    %c0_248 = arith.constant 0 : index
    %c127 = arith.constant 127 : index
    %177 = vector.load %arg9[%c0_248, %c127] : memref<8x401xf32, #tpu.memory_space<vmem>>, vector<8x256xf32>
    %c0_249 = arith.constant 0 : index
    %c0_250 = arith.constant 0 : index
    %c0_251 = arith.constant 0 : index
    %178 = vector.load %arg5[%c0_249, %c0_250, %c0_251] : memref<3x1x256xf32, #tpu.memory_space<vmem>>, vector<1x1x256xf32>
    %179 = vector.shape_cast %178 : vector<1x1x256xf32> to vector<1x256xf32>
    %180 = vector.broadcast %179 : vector<1x256xf32> to vector<8x256xf32>
    %181 = arith.mulf %177, %180 : vector<8x256xf32>
    %c24_252 = arith.constant 24 : index
    %c0_253 = arith.constant 0 : index
    %182 = vector.load %arg10[%c24_252, %c0_253] : memref<72x256xf32, #tpu.memory_space<vmem>>, vector<8x256xf32>
    tpu.vector_store %arg10[%c24_252, %c0_253], %181 {strides = array<i32>} : memref<72x256xf32, #tpu.memory_space<vmem>>, vector<8x256xf32>,
    %c0_254 = arith.constant 0 : index
    %c128_255 = arith.constant 128 : index
    %183 = vector.load %arg9[%c0_254, %c128_255] : memref<8x401xf32, #tpu.memory_space<vmem>>, vector<8x256xf32>
    %c32_256 = arith.constant 32 : index
    %c0_257 = arith.constant 0 : index
    %184 = vector.load %arg10[%c32_256, %c0_257] : memref<72x256xf32, #tpu.memory_space<vmem>>, vector<8x256xf32>
    tpu.vector_store %arg10[%c32_256, %c0_257], %183 {strides = array<i32>} : memref<72x256xf32, #tpu.memory_space<vmem>>, vector<8x256xf32>,
    %c0_258 = arith.constant 0 : index
    %c129 = arith.constant 129 : index
    %185 = vector.load %arg9[%c0_258, %c129] : memref<8x401xf32, #tpu.memory_space<vmem>>, vector<8x256xf32>
    %c2_259 = arith.constant 2 : index
    %c0_260 = arith.constant 0 : index
    %c0_261 = arith.constant 0 : index
    %186 = vector.load %arg5[%c2_259, %c0_260, %c0_261] : memref<3x1x256xf32, #tpu.memory_space<vmem>>, vector<1x1x256xf32>
    %187 = vector.shape_cast %186 : vector<1x1x256xf32> to vector<1x256xf32>
    %188 = vector.broadcast %187 : vector<1x256xf32> to vector<8x256xf32>
    %189 = arith.mulf %185, %188 : vector<8x256xf32>
    %c40_262 = arith.constant 40 : index
    %c0_263 = arith.constant 0 : index
    %190 = vector.load %arg10[%c40_262, %c0_263] : memref<72x256xf32, #tpu.memory_space<vmem>>, vector<8x256xf32>
    tpu.vector_store %arg10[%c40_262, %c0_263], %189 {strides = array<i32>} : memref<72x256xf32, #tpu.memory_space<vmem>>, vector<8x256xf32>,
    %c0_264 = arith.constant 0 : index
    %c143 = arith.constant 143 : index
    %191 = vector.load %arg9[%c0_264, %c143] : memref<8x401xf32, #tpu.memory_space<vmem>>, vector<8x256xf32>
    %c0_265 = arith.constant 0 : index
    %c0_266 = arith.constant 0 : index
    %c0_267 = arith.constant 0 : index
    %192 = vector.load %arg5[%c0_265, %c0_266, %c0_267] : memref<3x1x256xf32, #tpu.memory_space<vmem>>, vector<1x1x256xf32>
    %193 = vector.shape_cast %192 : vector<1x1x256xf32> to vector<1x256xf32>
    %194 = vector.broadcast %193 : vector<1x256xf32> to vector<8x256xf32>
    %195 = arith.mulf %191, %194 : vector<8x256xf32>
    %c48_268 = arith.constant 48 : index
    %c0_269 = arith.constant 0 : index
    %196 = vector.load %arg10[%c48_268, %c0_269] : memref<72x256xf32, #tpu.memory_space<vmem>>, vector<8x256xf32>
    tpu.vector_store %arg10[%c48_268, %c0_269], %195 {strides = array<i32>} : memref<72x256xf32, #tpu.memory_space<vmem>>, vector<8x256xf32>,
    %c0_270 = arith.constant 0 : index
    %c144_271 = arith.constant 144 : index
    %197 = vector.load %arg9[%c0_270, %c144_271] : memref<8x401xf32, #tpu.memory_space<vmem>>, vector<8x256xf32>
    %c56_272 = arith.constant 56 : index
    %c0_273 = arith.constant 0 : index
    %198 = vector.load %arg10[%c56_272, %c0_273] : memref<72x256xf32, #tpu.memory_space<vmem>>, vector<8x256xf32>
    tpu.vector_store %arg10[%c56_272, %c0_273], %197 {strides = array<i32>} : memref<72x256xf32, #tpu.memory_space<vmem>>, vector<8x256xf32>,
    %c0_274 = arith.constant 0 : index
    %c145 = arith.constant 145 : index
    %199 = vector.load %arg9[%c0_274, %c145] : memref<8x401xf32, #tpu.memory_space<vmem>>, vector<8x256xf32>
    %c2_275 = arith.constant 2 : index
    %c0_276 = arith.constant 0 : index
    %c0_277 = arith.constant 0 : index
    %200 = vector.load %arg5[%c2_275, %c0_276, %c0_277] : memref<3x1x256xf32, #tpu.memory_space<vmem>>, vector<1x1x256xf32>
    %201 = vector.shape_cast %200 : vector<1x1x256xf32> to vector<1x256xf32>
    %202 = vector.broadcast %201 : vector<1x256xf32> to vector<8x256xf32>
    %203 = arith.mulf %199, %202 : vector<8x256xf32>
    %c64 = arith.constant 64 : index
    %c0_278 = arith.constant 0 : index
    %204 = vector.load %arg10[%c64, %c0_278] : memref<72x256xf32, #tpu.memory_space<vmem>>, vector<8x256xf32>
    tpu.vector_store %arg10[%c64, %c0_278], %203 {strides = array<i32>} : memref<72x256xf32, #tpu.memory_space<vmem>>, vector<8x256xf32>,
    %c0_279 = arith.constant 0 : index
    %c0_280 = arith.constant 0 : index
    %205 = vector.load %arg6[%c0_279, %c0_280] : memref<4x72xf32, #tpu.memory_space<vmem>>, vector<4x72xf32>
    %c0_281 = arith.constant 0 : index
    %c0_282 = arith.constant 0 : index
    %206 = vector.load %arg10[%c0_281, %c0_282] : memref<72x256xf32, #tpu.memory_space<vmem>>, vector<72x256xf32>
    %cst_283 = arith.constant dense<0.000000e+00> : vector<4x256xf32>
    %207 = tpu.matmul %205, %206, %cst_283 {dimension_numbers = #tpu.dot_dimension_numbers<[1], [0], [0], [1], [0, 0, 1, 1], [], []>} : vector<4x72xf32>, vector<72x256xf32>, vector<4x256xf32> -> vector<4x256xf32>
    %cst_284 = arith.constant dense<0.000000e+00> : vector<4xf32>
    %208 = vector.multi_reduction <add>, %207, %cst_284 [1] : vector<4x256xf32> to vector<4xf32>
    %209 = vector.shape_cast %208 : vector<4xf32> to vector<4x1xf32>
    %cst_285 = arith.constant 2.560000e+02 : f32
    %210 = vector.broadcast %cst_285 : f32 to vector<4x1xf32>
    %211 = arith.divf %209, %210 : vector<4x1xf32>
    %212 = vector.broadcast %211 : vector<4x1xf32> to vector<4x256xf32>
    %213 = arith.subf %207, %212 : vector<4x256xf32>
    %214 = arith.mulf %213, %213 : vector<4x256xf32>
    %cst_286 = arith.constant dense<0.000000e+00> : vector<4xf32>
    %215 = vector.multi_reduction <add>, %214, %cst_286 [1] : vector<4x256xf32> to vector<4xf32>
    %216 = vector.shape_cast %215 : vector<4xf32> to vector<4x1xf32>
    %cst_287 = arith.constant 2.560000e+02 : f32
    %217 = vector.broadcast %cst_287 : f32 to vector<4x1xf32>
    %218 = arith.divf %216, %217 : vector<4x1xf32>
    %cst_288 = arith.constant 9.99999974E-6 : f32
    %219 = vector.broadcast %cst_288 : f32 to vector<4x1xf32>
    %220 = arith.addf %218, %219 : vector<4x1xf32>
    %221 = math.rsqrt %220 : vector<4x1xf32>
    %222 = vector.broadcast %221 : vector<4x1xf32> to vector<4x256xf32>
    %223 = arith.mulf %213, %222 : vector<4x256xf32>
    %cst_289 = arith.constant 0.000000e+00 : f32
    %224 = vector.broadcast %cst_289 : f32 to vector<4x256xf32>
    %225 = arith.maximumf %223, %224 : vector<4x256xf32>
    %c0_290 = arith.constant 0 : index
    %c128_291 = arith.constant 128 : index
    %226 = vector.load %arg9[%c0_290, %c128_291] : memref<8x401xf32, #tpu.memory_space<vmem>>, vector<4x256xf32>
    tpu.vector_store %arg9[%c0_290, %c128_291], %225 {strides = array<i32>} : memref<8x401xf32, #tpu.memory_space<vmem>>, vector<4x256xf32>,
    %c0_292 = arith.constant 0 : index
    %c111_293 = arith.constant 111 : index
    %227 = vector.load %arg9[%c0_292, %c111_293] : memref<8x401xf32, #tpu.memory_space<vmem>>, vector<4x256xf32>
    %c0_294 = arith.constant 0 : index
    %c0_295 = arith.constant 0 : index
    %c0_296 = arith.constant 0 : index
    %228 = vector.load %arg5[%c0_294, %c0_295, %c0_296] : memref<3x1x256xf32, #tpu.memory_space<vmem>>, vector<1x1x256xf32>
    %229 = vector.shape_cast %228 : vector<1x1x256xf32> to vector<1x256xf32>
    %230 = vector.broadcast %229 : vector<1x256xf32> to vector<4x256xf32>
    %231 = arith.mulf %227, %230 : vector<4x256xf32>
    %c0_297 = arith.constant 0 : index
    %c0_298 = arith.constant 0 : index
    %232 = vector.load %arg10[%c0_297, %c0_298] : memref<72x256xf32, #tpu.memory_space<vmem>>, vector<4x256xf32>
    tpu.vector_store %arg10[%c0_297, %c0_298], %231 {strides = array<i32>} : memref<72x256xf32, #tpu.memory_space<vmem>>, vector<4x256xf32>,
    %c0_299 = arith.constant 0 : index
    %c112_300 = arith.constant 112 : index
    %233 = vector.load %arg9[%c0_299, %c112_300] : memref<8x401xf32, #tpu.memory_space<vmem>>, vector<4x256xf32>
    %c4_301 = arith.constant 4 : index
    %c0_302 = arith.constant 0 : index
    %234 = vector.load %arg10[%c4_301, %c0_302] : memref<72x256xf32, #tpu.memory_space<vmem>>, vector<4x256xf32>
    tpu.vector_store %arg10[%c4_301, %c0_302], %233 {strides = array<i32>} : memref<72x256xf32, #tpu.memory_space<vmem>>, vector<4x256xf32>,
    %c0_303 = arith.constant 0 : index
    %c113_304 = arith.constant 113 : index
    %235 = vector.load %arg9[%c0_303, %c113_304] : memref<8x401xf32, #tpu.memory_space<vmem>>, vector<4x256xf32>
    %c2_305 = arith.constant 2 : index
    %c0_306 = arith.constant 0 : index
    %c0_307 = arith.constant 0 : index
    %236 = vector.load %arg5[%c2_305, %c0_306, %c0_307] : memref<3x1x256xf32, #tpu.memory_space<vmem>>, vector<1x1x256xf32>
    %237 = vector.shape_cast %236 : vector<1x1x256xf32> to vector<1x256xf32>
    %238 = vector.broadcast %237 : vector<1x256xf32> to vector<4x256xf32>
    %239 = arith.mulf %235, %238 : vector<4x256xf32>
    %c8_308 = arith.constant 8 : index
    %c0_309 = arith.constant 0 : index
    %240 = vector.load %arg10[%c8_308, %c0_309] : memref<72x256xf32, #tpu.memory_space<vmem>>, vector<4x256xf32>
    tpu.vector_store %arg10[%c8_308, %c0_309], %239 {strides = array<i32>} : memref<72x256xf32, #tpu.memory_space<vmem>>, vector<4x256xf32>,
    %c0_310 = arith.constant 0 : index
    %c127_311 = arith.constant 127 : index
    %241 = vector.load %arg9[%c0_310, %c127_311] : memref<8x401xf32, #tpu.memory_space<vmem>>, vector<4x256xf32>
    %c0_312 = arith.constant 0 : index
    %c0_313 = arith.constant 0 : index
    %c0_314 = arith.constant 0 : index
    %242 = vector.load %arg5[%c0_312, %c0_313, %c0_314] : memref<3x1x256xf32, #tpu.memory_space<vmem>>, vector<1x1x256xf32>
    %243 = vector.shape_cast %242 : vector<1x1x256xf32> to vector<1x256xf32>
    %244 = vector.broadcast %243 : vector<1x256xf32> to vector<4x256xf32>
    %245 = arith.mulf %241, %244 : vector<4x256xf32>
    %c12_315 = arith.constant 12 : index
    %c0_316 = arith.constant 0 : index
    %246 = vector.load %arg10[%c12_315, %c0_316] : memref<72x256xf32, #tpu.memory_space<vmem>>, vector<4x256xf32>
    tpu.vector_store %arg10[%c12_315, %c0_316], %245 {strides = array<i32>} : memref<72x256xf32, #tpu.memory_space<vmem>>, vector<4x256xf32>,
    %c0_317 = arith.constant 0 : index
    %c128_318 = arith.constant 128 : index
    %247 = vector.load %arg9[%c0_317, %c128_318] : memref<8x401xf32, #tpu.memory_space<vmem>>, vector<4x256xf32>
    %c16_319 = arith.constant 16 : index
    %c0_320 = arith.constant 0 : index
    %248 = vector.load %arg10[%c16_319, %c0_320] : memref<72x256xf32, #tpu.memory_space<vmem>>, vector<4x256xf32>
    tpu.vector_store %arg10[%c16_319, %c0_320], %247 {strides = array<i32>} : memref<72x256xf32, #tpu.memory_space<vmem>>, vector<4x256xf32>,
    %c0_321 = arith.constant 0 : index
    %c129_322 = arith.constant 129 : index
    %249 = vector.load %arg9[%c0_321, %c129_322] : memref<8x401xf32, #tpu.memory_space<vmem>>, vector<4x256xf32>
    %c2_323 = arith.constant 2 : index
    %c0_324 = arith.constant 0 : index
    %c0_325 = arith.constant 0 : index
    %250 = vector.load %arg5[%c2_323, %c0_324, %c0_325] : memref<3x1x256xf32, #tpu.memory_space<vmem>>, vector<1x1x256xf32>
    %251 = vector.shape_cast %250 : vector<1x1x256xf32> to vector<1x256xf32>
    %252 = vector.broadcast %251 : vector<1x256xf32> to vector<4x256xf32>
    %253 = arith.mulf %249, %252 : vector<4x256xf32>
    %c20_326 = arith.constant 20 : index
    %c0_327 = arith.constant 0 : index
    %254 = vector.load %arg10[%c20_326, %c0_327] : memref<72x256xf32, #tpu.memory_space<vmem>>, vector<4x256xf32>
    tpu.vector_store %arg10[%c20_326, %c0_327], %253 {strides = array<i32>} : memref<72x256xf32, #tpu.memory_space<vmem>>, vector<4x256xf32>,
    %c0_328 = arith.constant 0 : index
    %c143_329 = arith.constant 143 : index
    %255 = vector.load %arg9[%c0_328, %c143_329] : memref<8x401xf32, #tpu.memory_space<vmem>>, vector<4x256xf32>
    %c0_330 = arith.constant 0 : index
    %c0_331 = arith.constant 0 : index
    %c0_332 = arith.constant 0 : index
    %256 = vector.load %arg5[%c0_330, %c0_331, %c0_332] : memref<3x1x256xf32, #tpu.memory_space<vmem>>, vector<1x1x256xf32>
    %257 = vector.shape_cast %256 : vector<1x1x256xf32> to vector<1x256xf32>
    %258 = vector.broadcast %257 : vector<1x256xf32> to vector<4x256xf32>
    %259 = arith.mulf %255, %258 : vector<4x256xf32>
    %c24_333 = arith.constant 24 : index
    %c0_334 = arith.constant 0 : index
    %260 = vector.load %arg10[%c24_333, %c0_334] : memref<72x256xf32, #tpu.memory_space<vmem>>, vector<4x256xf32>
    tpu.vector_store %arg10[%c24_333, %c0_334], %259 {strides = array<i32>} : memref<72x256xf32, #tpu.memory_space<vmem>>, vector<4x256xf32>,
    %c0_335 = arith.constant 0 : index
    %c144_336 = arith.constant 144 : index
    %261 = vector.load %arg9[%c0_335, %c144_336] : memref<8x401xf32, #tpu.memory_space<vmem>>, vector<4x256xf32>
    %c28_337 = arith.constant 28 : index
    %c0_338 = arith.constant 0 : index
    %262 = vector.load %arg10[%c28_337, %c0_338] : memref<72x256xf32, #tpu.memory_space<vmem>>, vector<4x256xf32>
    tpu.vector_store %arg10[%c28_337, %c0_338], %261 {strides = array<i32>} : memref<72x256xf32, #tpu.memory_space<vmem>>, vector<4x256xf32>,
    %c0_339 = arith.constant 0 : index
    %c145_340 = arith.constant 145 : index
    %263 = vector.load %arg9[%c0_339, %c145_340] : memref<8x401xf32, #tpu.memory_space<vmem>>, vector<4x256xf32>
    %c2_341 = arith.constant 2 : index
    %c0_342 = arith.constant 0 : index
    %c0_343 = arith.constant 0 : index
    %264 = vector.load %arg5[%c2_341, %c0_342, %c0_343] : memref<3x1x256xf32, #tpu.memory_space<vmem>>, vector<1x1x256xf32>
    %265 = vector.shape_cast %264 : vector<1x1x256xf32> to vector<1x256xf32>
    %266 = vector.broadcast %265 : vector<1x256xf32> to vector<4x256xf32>
    %267 = arith.mulf %263, %266 : vector<4x256xf32>
    %c32_344 = arith.constant 32 : index
    %c0_345 = arith.constant 0 : index
    %268 = vector.load %arg10[%c32_344, %c0_345] : memref<72x256xf32, #tpu.memory_space<vmem>>, vector<4x256xf32>
    tpu.vector_store %arg10[%c32_344, %c0_345], %267 {strides = array<i32>} : memref<72x256xf32, #tpu.memory_space<vmem>>, vector<4x256xf32>,
    %c0_346 = arith.constant 0 : index
    %c0_347 = arith.constant 0 : index
    %269 = vector.load %arg7[%c0_346, %c0_347] : memref<4x36xf32, #tpu.memory_space<vmem>>, vector<4x36xf32>
    %c0_348 = arith.constant 0 : index
    %c0_349 = arith.constant 0 : index
    %270 = vector.load %arg10[%c0_348, %c0_349] : memref<72x256xf32, #tpu.memory_space<vmem>>, vector<36x256xf32>
    %cst_350 = arith.constant dense<0.000000e+00> : vector<4x256xf32>
    %271 = tpu.matmul %269, %270, %cst_350 {dimension_numbers = #tpu.dot_dimension_numbers<[1], [0], [0], [1], [0, 0, 1, 1], [], []>} : vector<4x36xf32>, vector<36x256xf32>, vector<4x256xf32> -> vector<4x256xf32>
    %cst_351 = arith.constant dense<0.000000e+00> : vector<4xf32>
    %272 = vector.multi_reduction <add>, %271, %cst_351 [1] : vector<4x256xf32> to vector<4xf32>
    %273 = vector.shape_cast %272 : vector<4xf32> to vector<4x1xf32>
    %cst_352 = arith.constant 2.560000e+02 : f32
    %274 = vector.broadcast %cst_352 : f32 to vector<4x1xf32>
    %275 = arith.divf %273, %274 : vector<4x1xf32>
    %276 = vector.broadcast %275 : vector<4x1xf32> to vector<4x256xf32>
    %277 = arith.subf %271, %276 : vector<4x256xf32>
    %278 = arith.mulf %277, %277 : vector<4x256xf32>
    %cst_353 = arith.constant dense<0.000000e+00> : vector<4xf32>
    %279 = vector.multi_reduction <add>, %278, %cst_353 [1] : vector<4x256xf32> to vector<4xf32>
    %280 = vector.shape_cast %279 : vector<4xf32> to vector<4x1xf32>
    %cst_354 = arith.constant 2.560000e+02 : f32
    %281 = vector.broadcast %cst_354 : f32 to vector<4x1xf32>
    %282 = arith.divf %280, %281 : vector<4x1xf32>
    %cst_355 = arith.constant 9.99999974E-6 : f32
    %283 = vector.broadcast %cst_355 : f32 to vector<4x1xf32>
    %284 = arith.addf %282, %283 : vector<4x1xf32>
    %285 = math.rsqrt %284 : vector<4x1xf32>
    %286 = vector.broadcast %285 : vector<4x1xf32> to vector<4x256xf32>
    %287 = arith.mulf %277, %286 : vector<4x256xf32>
    %cst_356 = arith.constant 0.000000e+00 : f32
    %288 = vector.broadcast %cst_356 : f32 to vector<4x256xf32>
    %289 = arith.maximumf %287, %288 : vector<4x256xf32>
    %c0_357 = arith.constant 0 : index
    %c0_358 = arith.constant 0 : index
    %c0_359 = arith.constant 0 : index
    %290 = vector.load %arg8[%c0_357, %c0_358, %c0_359] : memref<1x4x256xf32, #tpu.memory_space<vmem>>, vector<1x4x256xf32>
    %291 = vector.shape_cast %290 : vector<1x4x256xf32> to vector<4x256xf32>
    %292 = vector.shape_cast %289 : vector<4x256xf32> to vector<1x4x256xf32>
    tpu.vector_store %arg8[%c0_357, %c0_358, %c0_359], %292 {strides = array<i32>} : memref<1x4x256xf32, #tpu.memory_space<vmem>>, vector<1x4x256xf32>,
    return
  }
  func.func @transform_0(%arg0: i32) -> (i32, i32, i32) {
    %c0_i32 = arith.constant 0 : i32
    %c0_i32_0 = arith.constant 0 : i32
    %c0_i32_1 = arith.constant 0 : i32
    return %arg0, %c0_i32, %c0_i32_0 : i32, i32, i32
  }
  func.func @transform_1(%arg0: i32) -> (i32, i32, i32, i32) {
    %c0_i32 = arith.constant 0 : i32
    %c0_i32_0 = arith.constant 0 : i32
    %c0_i32_1 = arith.constant 0 : i32
    %c0_i32_2 = arith.constant 0 : i32
    return %arg0, %c0_i32, %c0_i32_0, %c0_i32_1 : i32, i32, i32, i32
  }
  func.func @transform_2(%arg0: i32) -> (i32, i32) {
    %c0_i32 = arith.constant 0 : i32
    %c0_i32_0 = arith.constant 0 : i32
    %c0_i32_1 = arith.constant 0 : i32
    return %c0_i32, %c0_i32_0 : i32, i32
  }
  func.func @transform_3(%arg0: i32) -> (i32, i32) {
    %c0_i32 = arith.constant 0 : i32
    %c0_i32_0 = arith.constant 0 : i32
    %c0_i32_1 = arith.constant 0 : i32
    return %c0_i32, %c0_i32_0 : i32, i32
  }
  func.func @transform_4(%arg0: i32) -> (i32, i32, i32) {
    %c0_i32 = arith.constant 0 : i32
    %c0_i32_0 = arith.constant 0 : i32
    %c0_i32_1 = arith.constant 0 : i32
    %c0_i32_2 = arith.constant 0 : i32
    return %c0_i32, %c0_i32_0, %c0_i32_1 : i32, i32, i32
  }
  func.func @transform_5(%arg0: i32) -> (i32, i32) {
    %c0_i32 = arith.constant 0 : i32
    %c0_i32_0 = arith.constant 0 : i32
    %c0_i32_1 = arith.constant 0 : i32
    return %c0_i32, %c0_i32_0 : i32, i32
  }
  func.func @transform_6(%arg0: i32) -> (i32, i32) {
    %c0_i32 = arith.constant 0 : i32
    %c0_i32_0 = arith.constant 0 : i32
    %c0_i32_1 = arith.constant 0 : i32
    return %c0_i32, %c0_i32_0 : i32, i32
  }
  func.func @transform_7(%arg0: i32) -> (i32, i32, i32) {
    %c0_i32 = arith.constant 0 : i32
    %c0_i32_0 = arith.constant 0 : i32
    %c0_i32_1 = arith.constant 0 : i32
    return %arg0, %c0_i32, %c0_i32_0 : i32, i32, i32
  }
}

</mosaic_0001>

<bundles_post_ra>
// kernel: up_forward.1
= control target key start
LH: loop header
LB: loop body
LE: loop exit
PB: predicated region body
PF: predicated region fallthrough
CT: control target
= control target key end

     0   :  { %s2416_s24 = smov 0   ;;  %s2841_s0 = inlined_call_operand.vmem [shape: f32[2,4,256], index: 0, kind: input, shape index: {}]   ;;  %s2842_s1 = inlined_call_operand.vmem [shape: f32[2,4,8,8], index: 1, kind: input, shape index: {}]   ;;  %s2843_s2 = inlined_call_operand.vmem [shape: f32[16,8], index: 2, kind: input, shape index: {}]   ;;  %s2844_s3 = inlined_call_operand.vmem [shape: f32[8,16], index: 3, kind: input, shape index: {}]   ;;  %s2845_s4 = inlined_call_operand.vmem [shape: f32[3,1,256], index: 4, kind: input, shape index: {}]   ;;  %s2846_s5 = inlined_call_operand.vmem [shape: f32[4,72], index: 5, kind: input, shape index: {}]   ;;  %s2847_s6 = inlined_call_operand.vmem [shape: f32[4,36], index: 6, kind: input, shape index: {}]   ;;  %s2848_s7 = inlined_call_operand.vmem [shape: f32[2,4,256], index: 7, kind: output, shape index: {}]  }
   0x1 LB: > { %s2218_s25 = sadd.s32 4294967295, %s2360_s24   ;;  %p2222_p0 = scmp.ge.s32.totalorder %s2360_s24, 1  ;;  %s2360_s24 = sphi %s2416_s24, %s17_s24  }
   0x2   : > { %p247_p1 = scmp.lt.s32.totalorder %s2360_s24, 3 }
   0x4   : > { %p248_p2 = pnand %p2222_p0, %p247_p1 }
   0x5   : > { %p284_p3 = scmp.lt.s32.totalorder (!%p248_p2), %s2218_s25, 1  ;;  %s2362_s17 = smov (!%p248_p2), 32  }
   0x6   : > { %251 = sbr.rel (%p248_p2) target bundleno = 1996 (0x7cc), region = 48  ;;  %s2363_s18 = smov (!%p248_p2), 16  }
   0x7   : > { %s2364_s19 = smov (!%p248_p2), 48   ;;  %s2365_s20 = smov (!%p248_p2), 64  }
   0x8   : > { %s2366_s21 = smov (!%p248_p2), 80   ;;  %s2367_s22 = smov (!%p248_p2), 96  }
   0x9   : > { %s2368_s23 = smov (!%p248_p2), 112   ;;  %s2370_s8 = smov (!%p248_p2), 17  }
   0xa   : > { %s2371_s11 = smov (!%p248_p2), 15   ;;  %s2372_s14 = smov (!%p248_p2), 1  }
   0xb   : > { %v302_v0 = vld [vmem:[%s2843_s2] sm:$0xff]  ;;  %vm305_vm0 = vcmask 64512   ;;  %s2850_s25 = smov (!%p284_p3, %s2218_s25), 1  ;;  %v303_v1 = vld [vmem:[%s2843_s2 + $0x8] sm:$0xff]  ;;  %vm469_vm1 = vcmask 130048   ;;  %vm986_vm2 = vcmask 122880  }
   0xc   : > { %2289 = vmatprep.mubr.msk.f32.mxu1 %vm305_vm0, %v302_v0  ;;  %2299 = vmatprep.mubr.msk.f32.mxu0 %vm305_vm0, %v302_v0  ;;  %s2260_s28 = sshll.u32 %s2850_s25, 3  ;;  %s2261_s29 = sshll.u32 %s2850_s25, 5  ;;  %v387_v7 = vld [vmem:[%s2844_s3] sm:$0xff]  ;;  %vm300_vm3 = vcmask 138240   ;;  %vm993_vm4 = vcmask 254080   ;;  %vm1000_vm5 = vcmask 385280  }
   0xd   : > { %s288_s9 = scalar_lea.vmem %s2841_s0, %s2260_s28  ;;  %s293_s12 = scalar_lea.vmem %s2842_s1, %s2261_s29  ;;  %vm1007_vm6 = vcmask 516480   ;;  %vm1014_vm7 = vcmask 647680   ;;  %vm1021_vm8 = vcmask 778880   ;;  %vm1028_vm9 = vcmask 910080  }
   0xe   : > { %v304_v2 = vld [vmem:[%s293_s12] sm:$0xff]  ;;  %v2233_v4 = vld [vmem:[%s293_s12 + $0x8] sm:$0xff]  ;;  %v2238_v6 = vld [vmem:[%s293_s12 + $0x10] sm:$0xff]  ;;  %vm1035_vm10 = vcmask 1041280   ;;  %vm1438_vm11 = vcmask 121856   ;;  %vm1479_vm12 = vcmask 7168  }
   0xf   : > { %v979_v3 = vld [vmem:[%s288_s9] sm:$0xff]  ;;  %2287 = vmatprep.subr.mxu1 %v304_v2  ;;  %2297 = vmatprep.subr.mxu0 %v2233_v4  ;;  %v2243_v8 = vld [vmem:[%s293_s12 + $0x18] sm:$0xff]  ;;  %vm1462_vm13 = vcmask 1039360   ;;  %vm1421_vm14 = vcmask 924672   ;;  %vm1362_vm15 = vcmask 908288  }
  0x10   : > { %v981_v5 = vcombine.high %v979_v3, %v979_v3  ;;  %983 = vst [vmem:[#allocation2 + $0x8] sm:$0xf] %v979_v3  ;;  %2288 = vmatpush3.msra.mxu1 %v304_v2  ;;  %2298 = vmatpush3.msra.mxu0 %v2233_v4 }
  0x11   : > { %2290 = vmatmul.mubr.msk.f32.vlgmr.msra.gmra.mxu1 %vm305_vm0, %v303_v1  ;;  %2300 = vmatmul.mubr.msk.f32.vlgmr.msra.gmra.mxu0 %vm305_vm0, %v303_v1 }
  0x12   : > { %984 = vst [vmem:[#allocation2 + $0x10] sm:$0xf] %v981_v5  ;;  %2307 = vmatprep.subr.mxu0 %v2238_v6  ;;  %2309 = vmatprep.mubr.msk.f32.mxu0 %vm305_vm0, %v302_v0 }
  0x13   : > { %2308 = vmatpush3.msra.mxu0 %v2238_v6  ;;  %2292 = vmatprep.subr.mxu1 %v387_v7 }
  0x14   : > { %2317 = vmatprep.subr.mxu0 %v2243_v8  ;;  %2293 = vmatpush3.msra.mxu1 %v387_v7 }
  0x15   : > { %2310 = vmatmul.mubr.msk.f32.vlgmr.msra.gmra.mxu0 %vm305_vm0, %v303_v1  ;;  %2302 = vmatprep.subr.mxu1 %v387_v7 }
  0x16   : > { %2318 = vmatpush3.msra.mxu0 %v2243_v8  ;;  %2319 = vmatprep.mubr.msk.f32.mxu0 %vm305_vm0, %v302_v0 }
  0x19   : > { %2320 = vmatmul.mubr.msk.f32.vlgmr.msra.gmra.mxu0 %vm305_vm0, %v303_v1 }
  0xd1   : > { %v2291_v9 = vpop.f32.mrf.mxu1  ;;  %v2301_v10 = vpop.f32.mrf.mxu0 }
  0xd3   : > { %v378_v11 = vpop.f32.mrf.mxu1  ;;  %v548_v12 = vpop.f32.mrf.mxu0 }
  0xd4   : > { %2294 = vmatprep.mubr.msk.f32.mxu1 %vm305_vm0, %v378_v11 }
  0xd5   : > { %2295 = vmatmul.mubr.msk.f32.vlgmr.msra.gmra.mxu1 %vm305_vm0, %v2291_v9  ;;  %v2311_v13 = vpop.f32.mrf.mxu0 }
  0xd6   : > { %2303 = vmatpush3.msra.mxu1 %v387_v7  ;;  %2304 = vmatprep.mubr.msk.f32.mxu1 %vm305_vm0, %v548_v12 }
  0xd7   : > { %v717_v14 = vpop.f32.mrf.mxu0  ;;  %2312 = vmatprep.subr.mxu1 %v387_v7 }
  0xd9   : > { %2305 = vmatmul.mubr.msk.f32.vlgmr.msra.gmra.mxu1 %vm305_vm0, %v2301_v10  ;;  %v2321_v15 = vpop.f32.mrf.mxu0 }
  0xda   : > { %2313 = vmatpush3.msra.mxu1 %v387_v7  ;;  %2314 = vmatprep.mubr.msk.f32.mxu1 %vm305_vm0, %v717_v14 }
  0xdb   : > { %v886_v16 = vpop.f32.mrf.mxu0  ;;  %2322 = vmatprep.subr.mxu1 %v387_v7 }
  0xdd   : > { %2315 = vmatmul.mubr.msk.f32.vlgmr.msra.gmra.mxu1 %vm305_vm0, %v2311_v13 }
  0xde   : > { %2323 = vmatpush3.msra.mxu1 %v387_v7  ;;  %2324 = vmatprep.mubr.msk.f32.mxu1 %vm305_vm0, %v886_v16 }
  0xe1   : > { %2325 = vmatmul.mubr.msk.f32.vlgmr.msra.gmra.mxu1 %vm305_vm0, %v2321_v15  ;;  %vm1580_vm0 = vcmask 916480  }
 0x195   : > { %v2296_v17 = vpop.f32.mrf.mxu1 }
 0x196   : > { %471 = vst.msk [vmem:[#allocation4 + $0x8] sm:$0xff] %vm469_vm1, %v2296_v17 }
 0x197   : > { %v460_v18 = vpop.f32.mrf.mxu1 }
 0x198   : > { %470 = vst.msk [vmem:[#allocation4] sm:$0xff] %vm469_vm1, %v460_v18 }
 0x199   : > { %v2306_v19 = vpop.f32.mrf.mxu1 }
 0x19a   : > { %640 = vst.msk [vmem:[#allocation4 + $0x18] sm:$0xff] %vm469_vm1, %v2306_v19  ;;  %v1350_v19 = vlaneseq }
 0x19b   : > { %v630_v20 = vpop.f32.mrf.mxu1 }
 0x19c   : > { %639 = vst.msk [vmem:[#allocation4 + $0x10] sm:$0xff] %vm469_vm1, %v630_v20 }
 0x19d   : > { %v1045_v21 = vld [vmem:[#allocation4 + $0xa] sm:$0x1]  ;;  %v1039_v22 = vld [vmem:[#allocation4 + $0x9] sm:$0x1]  ;;  %v2316_v23 = vpop.f32.mrf.mxu1  ;;  %v1051_v25 = vld [vmem:[#allocation4 + $0xb] sm:$0x1] }
 0x19e   : > { %1047 = vrot.lane.b32.xlu1 %v1045_v21, %s2362_s17  ;;  %1041 = vrot.lane.b32.xlu0 %v1039_v22, %s2363_s18  ;;  %809 = vst.msk [vmem:[#allocation4 + $0x28] sm:$0xff] %vm469_vm1, %v2316_v23  ;;  %v1057_v29 = vld [vmem:[#allocation4 + $0xc] sm:$0x1]  ;;  %v1063_v31 = vld [vmem:[#allocation4 + $0xd] sm:$0x1]  ;;  %v1351_v22 = vshrl.u32 %v1350_v19, 7 }
 0x19f   : > { %v799_v24 = vpop.f32.mrf.mxu1  ;;  %v988_v26 = vld [vmem:[#allocation4 + $0x1] sm:$0x1]  ;;  %v995_v30 = vld [vmem:[#allocation4 + $0x2] sm:$0x1]  ;;  %v1002_v32 = vld [vmem:[#allocation4 + $0x3] sm:$0x1] }
 0x1a0   : > { %808 = vst.msk [vmem:[#allocation4 + $0x20] sm:$0xff] %vm469_vm1, %v799_v24  ;;  %v1069_v33 = vld [vmem:[#allocation4 + $0xe] sm:$0x1]  ;;  %v1009_v34 = vld [vmem:[#allocation4 + $0x4] sm:$0x1] }
 0x1a1   : > { %v2326_v27 = vpop.f32.mrf.mxu1  ;;  %v1037_v35 = vld [vmem:[#allocation4 + $0x8] sm:$0x1]  ;;  %v985_v36 = vld [vmem:[#allocation4] sm:$0x1]  ;;  %v1075_v37 = vld [vmem:[#allocation4 + $0xf] sm:$0x1] }
 0x1a2   : > { %1053 = vrot.lane.b32.xlu1 %v1051_v25, %s2364_s19  ;;  %990 = vrot.lane.b32.xlu0 %v988_v26, %s2363_s18  ;;  %978 = vst.msk [vmem:[#allocation4 + $0x38] sm:$0xff] %vm469_vm1, %v2326_v27  ;;  %v1016_v38 = vld [vmem:[#allocation4 + $0x5] sm:$0x1]  ;;  %v1125_v39 = vld [vmem:[#allocation4 + $0x18] sm:$0x1]  ;;  %v2531_v25 = vsub.s32 1, %v1351_v22 }
 0x1a3   : > { %v968_v28 = vpop.f32.mrf.mxu1  ;;  %1038 = vst.msk [vmem:[#allocation2 + $0x14] sm:$0x1] %vm986_vm2, %v1037_v35  ;;  %987 = vst.msk [vmem:[#allocation2 + $0xc] sm:$0x1] %vm986_vm2, %v985_v36  ;;  %v1081_v40 = vld [vmem:[#allocation4 + $0x10] sm:$0x1] }
 0x1a4   : > { %977 = vst.msk [vmem:[#allocation4 + $0x30] sm:$0xff] %vm469_vm1, %v968_v28  ;;  %v1133_v43 = vld [vmem:[#allocation4 + $0x1a] sm:$0x1]  ;;  %v1023_v46 = vld [vmem:[#allocation4 + $0x6] sm:$0x1]  ;;  %v2533_v26 = vsub.s32 0, %v1351_v22 }
 0x1a5   : > { %1126 = vst.msk [vmem:[#allocation2 + $0x15] sm:$0x1] %vm986_vm2, %v1125_v39  ;;  %v1213_v41 = vld [vmem:[#allocation4 + $0x28] sm:$0x1]  ;;  %1082 = vst.msk [vmem:[#allocation2 + $0xd] sm:$0x1] %vm986_vm2, %v1081_v40 }
 0x1a6   : > { %1059 = vrot.lane.b32.xlu1 %v1057_v29, %s2365_s20  ;;  %997 = vrot.lane.b32.xlu0 %v995_v30, %s2362_s17  ;;  %1214 = vst.msk [vmem:[#allocation2 + $0x16] sm:$0x1] %vm986_vm2, %v1213_v41  ;;  %v1139_v47 = vld [vmem:[#allocation4 + $0x1b] sm:$0x1]  ;;  %v1030_v48 = vld [vmem:[#allocation4 + $0x7] sm:$0x1] }
 0x1a7   : > { %v1169_v42 = vld [vmem:[#allocation4 + $0x20] sm:$0x1]  ;;  %v1145_v49 = vld [vmem:[#allocation4 + $0x1c] sm:$0x1]  ;;  %v1127_v50 = vld [vmem:[#allocation4 + $0x19] sm:$0x1] }
 0x1a8   : > { %1170 = vst.msk [vmem:[#allocation2 + $0xe] sm:$0x1] %vm986_vm2, %v1169_v42  ;;  %v1151_v51 = vld [vmem:[#allocation4 + $0x1d] sm:$0x1]  ;;  %v1083_v52 = vld [vmem:[#allocation4 + $0x11] sm:$0x1] }
 0x1a9   : > { %v1301_v44 = vld [vmem:[#allocation4 + $0x38] sm:$0x1]  ;;  %v1157_v53 = vld [vmem:[#allocation4 + $0x1e] sm:$0x1]  ;;  %v1089_v54 = vld [vmem:[#allocation4 + $0x12] sm:$0x1] }
 0x1aa   : > { %1065 = vrot.lane.b32.xlu1 %v1063_v31, %s2366_s21  ;;  %1004 = vrot.lane.b32.xlu0 %v1002_v32, %s2364_s19  ;;  %1302 = vst.msk [vmem:[#allocation2 + $0x17] sm:$0x1] %vm986_vm2, %v1301_v44  ;;  %v1163_v55 = vld [vmem:[#allocation4 + $0x1f] sm:$0x1]  ;;  %v1095_v56 = vld [vmem:[#allocation4 + $0x13] sm:$0x1] }
 0x1ab   : > { %v1257_v45 = vld [vmem:[#allocation4 + $0x30] sm:$0x1]  ;;  %v1119_v57 = vld [vmem:[#allocation4 + $0x17] sm:$0x1]  ;;  %v1101_v58 = vld [vmem:[#allocation4 + $0x14] sm:$0x1] }
 0x1ac   : > { %1258 = vst.msk [vmem:[#allocation2 + $0xf] sm:$0x1] %vm986_vm2, %v1257_v45  ;;  %v1215_v59 = vld [vmem:[#allocation4 + $0x29] sm:$0x1]  ;;  %v1107_v60 = vld [vmem:[#allocation4 + $0x15] sm:$0x1] }
 0x1ad   : > { %v1221_v61 = vld [vmem:[#allocation4 + $0x2a] sm:$0x1]  ;;  %v1113_v62 = vld [vmem:[#allocation4 + $0x16] sm:$0x1]  ;;  %v1227_v63 = vld [vmem:[#allocation4 + $0x2b] sm:$0x1] }
 0x1ae   : > { %1071 = vrot.lane.b32.xlu1 %v1069_v33, %s2367_s22  ;;  %1011 = vrot.lane.b32.xlu0 %v1009_v34, %s2365_s20  ;;  %v1171_v0 = vld [vmem:[#allocation4 + $0x21] sm:$0x1]  ;;  %v1233_v1 = vld [vmem:[#allocation4 + $0x2c] sm:$0x1]  ;;  %v1177_v2 = vld [vmem:[#allocation4 + $0x22] sm:$0x1] }
 0x1af   : > { %v1239_v3 = vld [vmem:[#allocation4 + $0x2d] sm:$0x1]  ;;  %v1183_v4 = vld [vmem:[#allocation4 + $0x23] sm:$0x1]  ;;  %v1245_v5 = vld [vmem:[#allocation4 + $0x2e] sm:$0x1] }
 0x1b0   : > { %v1189_v6 = vld [vmem:[#allocation4 + $0x24] sm:$0x1]  ;;  %v1251_v7 = vld [vmem:[#allocation4 + $0x2f] sm:$0x1]  ;;  %v1195_v8 = vld [vmem:[#allocation4 + $0x25] sm:$0x1] }
 0x1b1   : > { %v1303_v9 = vld [vmem:[#allocation4 + $0x39] sm:$0x1]  ;;  %v1201_v10 = vld [vmem:[#allocation4 + $0x26] sm:$0x1]  ;;  %v1309_v11 = vld [vmem:[#allocation4 + $0x3a] sm:$0x1] }
 0x1b2   : > { %1077 = vrot.lane.b32.xlu1 %v1075_v37, %s2368_s23  ;;  %1018 = vrot.lane.b32.xlu0 %v1016_v38, %s2366_s21  ;;  %v1207_v12 = vld [vmem:[#allocation4 + $0x27] sm:$0x1]  ;;  %v1315_v13 = vld [vmem:[#allocation4 + $0x3b] sm:$0x1]  ;;  %v1259_v14 = vld [vmem:[#allocation4 + $0x31] sm:$0x1] }
 0x1b3   : > { %v1321_v15 = vld [vmem:[#allocation4 + $0x3c] sm:$0x1]  ;;  %v1265_v16 = vld [vmem:[#allocation4 + $0x32] sm:$0x1]  ;;  %v1327_v17 = vld [vmem:[#allocation4 + $0x3d] sm:$0x1] }
 0x1b4   : > { %v1271_v18 = vld [vmem:[#allocation4 + $0x33] sm:$0x1]  ;;  %v1333_v20 = vld [vmem:[#allocation4 + $0x3e] sm:$0x1]  ;;  %v1277_v21 = vld [vmem:[#allocation4 + $0x34] sm:$0x1] }
 0x1b5   : > { %v1339_v23 = vld [vmem:[#allocation4 + $0x3f] sm:$0x1]  ;;  %v1283_v24 = vld [vmem:[#allocation4 + $0x35] sm:$0x1]  ;;  %v2369_v28 = vmov 0.0   ;;  %vm1645_vm2 = vcmask 588800  }
 0x1b6   : > { %1135 = vrot.lane.b32.xlu1 %v1133_v43, %s2362_s17  ;;  %1025 = vrot.lane.b32.xlu0 %v1023_v46, %s2367_s22  ;;  %v2250_v27 = vld [vmem:[%s2845_s4 + $0x4] sm:$0x3]  ;;  %301 = vst.msk [vmem:[#allocation2 + $0x18] sm:$0xff] %vm300_vm3, %v2369_v28  ;;  %299 = vst [vmem:[#allocation2] sm:$0xff] %v2369_v28  ;;  %v1295_v29 = vld [vmem:[#allocation4 + $0x37] sm:$0x1] }
 0x1b7   : > { %1713 = vmatprep.mubr.f32.mxu0 %v2369_v28  ;;  %2117 = vmatprep.mubr.f32.mxu1 %v2369_v28  ;;  %v1289_v30 = vld [vmem:[#allocation4 + $0x36] sm:$0x1]  ;;  %v1599_v31 = vrot.slane %v2250_v27, %v2531_v25  ;;  %v1595_v32 = vrot.slane %v2250_v27, %v2533_v26  ;;  %v1532_v33 = vld [vmem:[%s2845_s4] sm:$0x3]  ;;  %v2249_v36 = vld [vmem:[%s2845_s4 + $0x4] sm:$0x3] }
 0x1b8   : > { %v1541_v34 = vrot.slane %v1532_v33, %v2531_v25  ;;  %v1537_v35 = vrot.slane %v1532_v33, %v2533_v26  ;;  %v1502_v39 = vrot.slane %v2249_v36, %v2531_v25  ;;  %v1498_v40 = vrot.slane %v2249_v36, %v2533_v26  ;;  %v1448_v41 = vld [vmem:[%s2845_s4] sm:$0x3]  ;;  %v2248_v46 = vld [vmem:[%s2845_s4 + $0x4] sm:$0x3] }
 0x1b9   : > { %v1457_v44 = vrot.slane %v1448_v41, %v2531_v25  ;;  %v1453_v45 = vrot.slane %v1448_v41, %v2533_v26 }
 0x1ba   : > { %1141 = vrot.lane.b32.xlu1 %v1139_v47, %s2364_s19  ;;  %1032 = vrot.lane.b32.xlu0 %v1030_v48, %s2368_s23 }
 0x1be   : > { %1147 = vrot.lane.b32.xlu1 %v1145_v49, %s2365_s20  ;;  %1129 = vrot.lane.b32.xlu0 %v1127_v50, %s2363_s18  ;;  %v1416_v49 = vrot.slane %v2248_v46, %v2531_v25  ;;  %v1412_v50 = vrot.slane %v2248_v46, %v2533_v26 }
 0x1c2   : > { %1153 = vrot.lane.b32.xlu1 %v1151_v51, %s2366_s21  ;;  %1085 = vrot.lane.b32.xlu0 %v1083_v52, %s2363_s18  ;;  %v1348_v51 = vld [vmem:[%s2845_s4] sm:$0x3] }
 0x1c6   : > { %1159 = vrot.lane.b32.xlu1 %v1157_v53, %s2367_s22  ;;  %1091 = vrot.lane.b32.xlu0 %v1089_v54, %s2362_s17  ;;  %v1357_v54 = vrot.slane %v1348_v51, %v2531_v25 }
 0x1ca   : > { %1165 = vrot.lane.b32.xlu1 %v1163_v55, %s2368_s23  ;;  %1097 = vrot.lane.b32.xlu0 %v1095_v56, %s2364_s19  ;;  %v1353_v55 = vrot.slane %v1348_v51, %v2533_v26 }
 0x1ce   : > { %1121 = vrot.lane.b32.xlu1 %v1119_v57, %s2368_s23  ;;  %1103 = vrot.lane.b32.xlu0 %v1101_v58, %s2365_s20 }
 0x1d2   : > { %1217 = vrot.lane.b32.xlu1 %v1215_v59, %s2363_s18  ;;  %1109 = vrot.lane.b32.xlu0 %v1107_v60, %s2366_s21  ;;  %v2596_v60 = vld [vmem:[#allocation2 + $0x18] sm:$0xff] }
 0x1d6   : > { %1223 = vrot.lane.b32.xlu1 %v1221_v61, %s2362_s17  ;;  %1115 = vrot.lane.b32.xlu0 %v1113_v62, %s2367_s22 }
 0x1da   : > { %1229 = vrot.lane.b32.xlu1 %v1227_v63, %s2364_s19  ;;  %1173 = vrot.lane.b32.xlu0 %v1171_v0, %s2363_s18 }
 0x1de   : > { %1235 = vrot.lane.b32.xlu1 %v1233_v1, %s2365_s20  ;;  %1179 = vrot.lane.b32.xlu0 %v1177_v2, %s2362_s17 }
 0x1e2   : > { %1241 = vrot.lane.b32.xlu1 %v1239_v3, %s2366_s21  ;;  %1185 = vrot.lane.b32.xlu0 %v1183_v4, %s2364_s19 }
 0x1e6   : > { %1247 = vrot.lane.b32.xlu1 %v1245_v5, %s2367_s22  ;;  %1191 = vrot.lane.b32.xlu0 %v1189_v6, %s2365_s20 }
 0x1ea   : > { %1253 = vrot.lane.b32.xlu1 %v1251_v7, %s2368_s23  ;;  %1197 = vrot.lane.b32.xlu0 %v1195_v8, %s2366_s21 }
 0x1ee   : > { %1305 = vrot.lane.b32.xlu1 %v1303_v9, %s2363_s18  ;;  %1203 = vrot.lane.b32.xlu0 %v1201_v10, %s2367_s22 }
 0x1f2   : > { %1311 = vrot.lane.b32.xlu1 %v1309_v11, %s2362_s17  ;;  %1209 = vrot.lane.b32.xlu0 %v1207_v12, %s2368_s23 }
 0x1f6   : > { %1317 = vrot.lane.b32.xlu1 %v1315_v13, %s2364_s19  ;;  %1261 = vrot.lane.b32.xlu0 %v1259_v14, %s2363_s18 }
 0x1fa   : > { %1323 = vrot.lane.b32.xlu1 %v1321_v15, %s2365_s20  ;;  %1267 = vrot.lane.b32.xlu0 %v1265_v16, %s2362_s17  ;;  %s2373_s17 = smov 127  }
 0x1fe   : > { %1329 = vrot.lane.b32.xlu1 %v1327_v17, %s2366_s21  ;;  %1273 = vrot.lane.b32.xlu0 %v1271_v18, %s2364_s19 }
 0x202   : > { %1335 = vrot.lane.b32.xlu1 %v1333_v20, %s2367_s22  ;;  %1279 = vrot.lane.b32.xlu0 %v1277_v21, %s2365_s20 }
 0x206   : > { %1341 = vrot.lane.b32.xlu1 %v1339_v23, %s2368_s23  ;;  %1285 = vrot.lane.b32.xlu0 %v1283_v24, %s2366_s21  ;;  %s2374_s21 = smov 113  }
 0x20a   : > { %1297 = vrot.lane.b32.xlu1 %v1295_v29, %s2368_s23  ;;  %1291 = vrot.lane.b32.xlu0 %v1289_v30, %s2367_s22  ;;  %s2375_s22 = smov 111  }
 0x20e   : > { %1602 = vrot.lane.b32.xlu1 %v1599_v31, %s2370_s8  ;;  %1600 = vrot.lane.b32.xlu0 %v1595_v32, %s2370_s8 }
 0x210   : > { %v1048_v37 = vpop.permute.xlu1 %1047  ;;  %v1042_v38 = vpop.permute.xlu0 %1041 }
 0x211   : > { %1044 = vst.msk [vmem:[#allocation2 + $0x14] sm:$0x1] %vm993_vm4, %v1042_v38 }
 0x212   : > { %1544 = vrot.lane.b32.xlu1 %v1541_v34, %s2371_s11  ;;  %1542 = vrot.lane.b32.xlu0 %v1537_v35, %s2371_s11  ;;  %1050 = vst.msk [vmem:[#allocation2 + $0x14] sm:$0x1] %vm1000_vm5, %v1048_v37 }
 0x214   : > { %v1054_v42 = vpop.permute.xlu1 %1053  ;;  %v991_v43 = vpop.permute.xlu0 %990 }
 0x215   : > { %1056 = vst.msk [vmem:[#allocation2 + $0x14] sm:$0x1] %vm1007_vm6, %v1054_v42 }
 0x216   : > { %994 = vst.msk [vmem:[#allocation2 + $0xc] sm:$0x1] %vm993_vm4, %v991_v43  ;;  %1505 = vrot.lane.b32.xlu1 %v1502_v39, %s2372_s14  ;;  %1503 = vrot.lane.b32.xlu0 %v1498_v40, %s2372_s14 }
 0x218   : > { %v1060_v47 = vpop.permute.xlu1 %1059  ;;  %v998_v48 = vpop.permute.xlu0 %997 }
 0x219   : > { %1062 = vst.msk [vmem:[#allocation2 + $0x14] sm:$0x1] %vm1014_vm7, %v1060_v47 }
 0x21a   : > { %1001 = vst.msk [vmem:[#allocation2 + $0xc] sm:$0x1] %vm1000_vm5, %v998_v48  ;;  %1460 = vrot.lane.b32.xlu1 %v1457_v44, %s2373_s17  ;;  %1458 = vrot.lane.b32.xlu0 %v1453_v45, %s2373_s17 }
 0x21c   : > { %v1066_v52 = vpop.permute.xlu1 %1065  ;;  %v1005_v53 = vpop.permute.xlu0 %1004 }
 0x21d   : > { %1068 = vst.msk [vmem:[#allocation2 + $0x14] sm:$0x1] %vm1021_vm8, %v1066_v52 }
 0x21e   : > { %1008 = vst.msk [vmem:[#allocation2 + $0xc] sm:$0x1] %vm1007_vm6, %v1005_v53  ;;  %1419 = vrot.lane.b32.xlu1 %v1416_v49, %s2374_s21  ;;  %1417 = vrot.lane.b32.xlu0 %v1412_v50, %s2374_s21 }
 0x220   : > { %v1072_v56 = vpop.permute.xlu1 %1071  ;;  %v1012_v57 = vpop.permute.xlu0 %1011 }
 0x221   : > { %1074 = vst.msk [vmem:[#allocation2 + $0x14] sm:$0x1] %vm1028_vm9, %v1072_v56 }
 0x222   : > { %1015 = vst.msk [vmem:[#allocation2 + $0xc] sm:$0x1] %vm1014_vm7, %v1012_v57  ;;  %1360 = vrot.lane.b32.xlu1 %v1357_v54, %s2375_s22  ;;  %1358 = vrot.lane.b32.xlu0 %v1353_v55, %s2375_s22 }
 0x224   : > { %v1078_v58 = vpop.permute.xlu1 %1077  ;;  %v1019_v59 = vpop.permute.xlu0 %1018 }
 0x225   : > { %1080 = vst.msk [vmem:[#allocation2 + $0x14] sm:$0x1] %vm1035_vm10, %v1078_v58 }
 0x226   : > { %1022 = vst.msk [vmem:[#allocation2 + $0xc] sm:$0x1] %vm1021_vm8, %v1019_v59  ;;  %1578 = vrot.lane.b32.xlu0 %v2596_v60, %s2368_s23 }
 0x228   : > { %v1136_v61 = vpop.permute.xlu1 %1135  ;;  %v1026_v62 = vpop.permute.xlu0 %1025 }
 0x229   : > { %1029 = vst.msk [vmem:[#allocation2 + $0xc] sm:$0x1] %vm1028_vm9, %v1026_v62 }
 0x22c   : > { %v1142_v63 = vpop.permute.xlu1 %1141  ;;  %v1033_v0 = vpop.permute.xlu0 %1032 }
 0x22d   : > { %1036 = vst.msk [vmem:[#allocation2 + $0xc] sm:$0x1] %vm1035_vm10, %v1033_v0 }
 0x230   : > { %v1148_v1 = vpop.permute.xlu1 %1147  ;;  %v1130_v2 = vpop.permute.xlu0 %1129 }
 0x231   : > { %1132 = vst.msk [vmem:[#allocation2 + $0x15] sm:$0x1] %vm993_vm4, %v1130_v2 }
 0x232   : > { %1138 = vst.msk [vmem:[#allocation2 + $0x15] sm:$0x1] %vm1000_vm5, %v1136_v61 }
 0x233   : > { %1144 = vst.msk [vmem:[#allocation2 + $0x15] sm:$0x1] %vm1007_vm6, %v1142_v63 }
 0x234   : > { %v1154_v3 = vpop.permute.xlu1 %1153  ;;  %1150 = vst.msk [vmem:[#allocation2 + $0x15] sm:$0x1] %vm1014_vm7, %v1148_v1  ;;  %v1086_v4 = vpop.permute.xlu0 %1085 }
 0x235   : > { %1156 = vst.msk [vmem:[#allocation2 + $0x15] sm:$0x1] %vm1021_vm8, %v1154_v3 }
 0x236   : > { %1088 = vst.msk [vmem:[#allocation2 + $0xd] sm:$0x1] %vm993_vm4, %v1086_v4 }
 0x238   : > { %v1160_v5 = vpop.permute.xlu1 %1159  ;;  %v1092_v6 = vpop.permute.xlu0 %1091 }
 0x239   : > { %1162 = vst.msk [vmem:[#allocation2 + $0x15] sm:$0x1] %vm1028_vm9, %v1160_v5 }
 0x23a   : > { %1094 = vst.msk [vmem:[#allocation2 + $0xd] sm:$0x1] %vm1000_vm5, %v1092_v6 }
 0x23c   : > { %v1166_v7 = vpop.permute.xlu1 %1165  ;;  %v1098_v8 = vpop.permute.xlu0 %1097 }
 0x23d   : > { %1168 = vst.msk [vmem:[#allocation2 + $0x15] sm:$0x1] %vm1035_vm10, %v1166_v7 }
 0x23e   : > { %1100 = vst.msk [vmem:[#allocation2 + $0xd] sm:$0x1] %vm1007_vm6, %v1098_v8 }
 0x240   : > { %v1122_v9 = vpop.permute.xlu1 %1121  ;;  %v1104_v10 = vpop.permute.xlu0 %1103 }
 0x241   : > { %1106 = vst.msk [vmem:[#allocation2 + $0xd] sm:$0x1] %vm1014_vm7, %v1104_v10 }
 0x244   : > { %v1218_v11 = vpop.permute.xlu1 %1217  ;;  %v1110_v12 = vpop.permute.xlu0 %1109 }
 0x245   : > { %1220 = vst.msk [vmem:[#allocation2 + $0x16] sm:$0x1] %vm993_vm4, %v1218_v11 }
 0x246   : > { %1112 = vst.msk [vmem:[#allocation2 + $0xd] sm:$0x1] %vm1021_vm8, %v1110_v12 }
 0x248   : > { %v1224_v13 = vpop.permute.xlu1 %1223  ;;  %v1116_v14 = vpop.permute.xlu0 %1115 }
 0x249   : > { %1226 = vst.msk [vmem:[#allocation2 + $0x16] sm:$0x1] %vm1000_vm5, %v1224_v13 }
 0x24a   : > { %1118 = vst.msk [vmem:[#allocation2 + $0xd] sm:$0x1] %vm1028_vm9, %v1116_v14 }
 0x24b   : > { %1124 = vst.msk [vmem:[#allocation2 + $0xd] sm:$0x1] %vm1035_vm10, %v1122_v9 }
 0x24c   : > { %v1230_v15 = vpop.permute.xlu1 %1229  ;;  %v1174_v16 = vpop.permute.xlu0 %1173 }
 0x24d   : > { %1232 = vst.msk [vmem:[#allocation2 + $0x16] sm:$0x1] %vm1007_vm6, %v1230_v15 }
 0x24e   : > { %1176 = vst.msk [vmem:[#allocation2 + $0xe] sm:$0x1] %vm993_vm4, %v1174_v16 }
 0x250   : > { %v1236_v17 = vpop.permute.xlu1 %1235  ;;  %v1180_v18 = vpop.permute.xlu0 %1179 }
 0x251   : > { %1238 = vst.msk [vmem:[#allocation2 + $0x16] sm:$0x1] %vm1014_vm7, %v1236_v17 }
 0x252   : > { %1182 = vst.msk [vmem:[#allocation2 + $0xe] sm:$0x1] %vm1000_vm5, %v1180_v18 }
 0x254   : > { %v1242_v19 = vpop.permute.xlu1 %1241  ;;  %v1186_v20 = vpop.permute.xlu0 %1185 }
 0x255   : > { %1244 = vst.msk [vmem:[#allocation2 + $0x16] sm:$0x1] %vm1021_vm8, %v1242_v19 }
 0x256   : > { %1188 = vst.msk [vmem:[#allocation2 + $0xe] sm:$0x1] %vm1007_vm6, %v1186_v20 }
 0x258   : > { %v1248_v21 = vpop.permute.xlu1 %1247  ;;  %v1192_v22 = vpop.permute.xlu0 %1191 }
 0x259   : > { %1250 = vst.msk [vmem:[#allocation2 + $0x16] sm:$0x1] %vm1028_vm9, %v1248_v21 }
 0x25a   : > { %1194 = vst.msk [vmem:[#allocation2 + $0xe] sm:$0x1] %vm1014_vm7, %v1192_v22 }
 0x25c   : > { %v1254_v23 = vpop.permute.xlu1 %1253  ;;  %v1198_v24 = vpop.permute.xlu0 %1197 }
 0x25d   : > { %1256 = vst.msk [vmem:[#allocation2 + $0x16] sm:$0x1] %vm1035_vm10, %v1254_v23 }
 0x25e   : > { %1200 = vst.msk [vmem:[#allocation2 + $0xe] sm:$0x1] %vm1021_vm8, %v1198_v24 }
 0x260   : > { %v1306_v27 = vpop.permute.xlu1 %1305  ;;  %v1204_v29 = vpop.permute.xlu0 %1203 }
 0x261   : > { %1308 = vst.msk [vmem:[#allocation2 + $0x17] sm:$0x1] %vm993_vm4, %v1306_v27 }
 0x262   : > { %1206 = vst.msk [vmem:[#allocation2 + $0xe] sm:$0x1] %vm1028_vm9, %v1204_v29 }
 0x264   : > { %v1312_v30 = vpop.permute.xlu1 %1311  ;;  %v1210_v31 = vpop.permute.xlu0 %1209 }
 0x265   : > { %1314 = vst.msk [vmem:[#allocation2 + $0x17] sm:$0x1] %vm1000_vm5, %v1312_v30 }
 0x266   : > { %1212 = vst.msk [vmem:[#allocation2 + $0xe] sm:$0x1] %vm1035_vm10, %v1210_v31 }
 0x268   : > { %v1318_v32 = vpop.permute.xlu1 %1317  ;;  %v1262_v33 = vpop.permute.xlu0 %1261 }
 0x269   : > { %1320 = vst.msk [vmem:[#allocation2 + $0x17] sm:$0x1] %vm1007_vm6, %v1318_v32 }
 0x26a   : > { %1264 = vst.msk [vmem:[#allocation2 + $0xf] sm:$0x1] %vm993_vm4, %v1262_v33  ;;  %vm1720_vm4 = vcmask 1043456  }
 0x26c   : > { %v1324_v34 = vpop.permute.xlu1 %1323  ;;  %v1268_v35 = vpop.permute.xlu0 %1267 }
 0x26d   : > { %1326 = vst.msk [vmem:[#allocation2 + $0x17] sm:$0x1] %vm1014_vm7, %v1324_v34 }
 0x26e   : > { %1270 = vst.msk [vmem:[#allocation2 + $0xf] sm:$0x1] %vm1000_vm5, %v1268_v35 }
 0x270   : > { %v1330_v36 = vpop.permute.xlu1 %1329  ;;  %v1274_v37 = vpop.permute.xlu0 %1273 }
 0x271   : > { %1332 = vst.msk [vmem:[#allocation2 + $0x17] sm:$0x1] %vm1021_vm8, %v1330_v36 }
 0x272   : > { %1276 = vst.msk [vmem:[#allocation2 + $0xf] sm:$0x1] %vm1007_vm6, %v1274_v37 }
 0x274   : > { %v1336_v38 = vpop.permute.xlu1 %1335  ;;  %v1280_v39 = vpop.permute.xlu0 %1279 }
 0x275   : > { %1338 = vst.msk [vmem:[#allocation2 + $0x17] sm:$0x1] %vm1028_vm9, %v1336_v38 }
 0x276   : > { %1282 = vst.msk [vmem:[#allocation2 + $0xf] sm:$0x1] %vm1014_vm7, %v1280_v39 }
 0x278   : > { %v1342_v40 = vpop.permute.xlu1 %1341  ;;  %v1286_v41 = vpop.permute.xlu0 %1285 }
 0x279   : > { %1344 = vst.msk [vmem:[#allocation2 + $0x17] sm:$0x1] %vm1035_vm10, %v1342_v40 }
 0x27a   : > { %1288 = vst.msk [vmem:[#allocation2 + $0xf] sm:$0x1] %vm1021_vm8, %v1286_v41 }
 0x27c   : > { %v1298_v42 = vpop.permute.xlu1 %1297  ;;  %v1292_v43 = vpop.permute.xlu0 %1291 }
 0x27d   : > { %1294 = vst.msk [vmem:[#allocation2 + $0xf] sm:$0x1] %vm1028_vm9, %v1292_v43 }
 0x27e   : > { %1300 = vst.msk [vmem:[#allocation2 + $0xf] sm:$0x1] %vm1035_vm10, %v1298_v42 }
 0x280   : > { %v2644_v44 = vld [vmem:[#allocation2 + $0x10] sm:$0xff]  ;;  %v1603_v45 = vpop.permute.xlu1 %1602  ;;  %v1601_v46 = vpop.permute.xlu0 %1600 }
 0x281   : > { %1489 = vst [vmem:[#allocation3 + $0x40] sm:$0xff] %v2644_v44  ;;  %v1610_v47 = vmul.f32 %v1603_v45, %v2596_v60  ;;  %v1604_v57 = vsel %vm300_vm3, %v1601_v46, %v1603_v45 }
 0x282   : > { %v1609_v61 = vmul.f32 %v1604_v57, %v2644_v44 }
 0x283   : > { %1618 = vrot.lane.b32.xlu1 %v1610_v47, %s2375_s22 }
 0x284   : > { %v1545_v48 = vpop.permute.xlu1 %1544  ;;  %v1543_v49 = vpop.permute.xlu0 %1542 }
 0x285   : > { %v2649_v50 = vld [vmem:[#allocation2 + $0x8] sm:$0xff]  ;;  %v1552_v51 = vmul.f32 %v2596_v60, %v1545_v48  ;;  %v1546_v63 = vsel %vm1438_vm11, %v1543_v49, %v1545_v48 }
 0x286   : > { %1488 = vst [vmem:[#allocation3 + $0x88] sm:$0xff] %v2649_v50  ;;  %v1608_v3 = vmul.f32 %v1601_v46, %v2649_v50  ;;  %v1550_v5 = vmul.f32 %v1543_v49, %v2649_v50 }
 0x287   : > { %1560 = vrot.lane.b32.xlu1 %v1552_v51, %s2374_s21 }
 0x288   : > { %v1506_v52 = vpop.permute.xlu1 %1505  ;;  %v1504_v53 = vpop.permute.xlu0 %1503 }
 0x289   : > { %v1513_v54 = vmul.f32 %v2596_v60, %v1506_v52  ;;  %v1551_v60 = vmul.f32 %v1546_v63, %v2644_v44  ;;  %v1507_v2 = vsel %vm1479_vm12, %v1504_v53, %v1506_v52  ;;  %v1511_v8 = vmul.f32 %v1504_v53, %v2649_v50 }
 0x28a   : > { %v1512_v4 = vmul.f32 %v1507_v2, %v2644_v44 }
 0x28b   : > { %1521 = vrot.lane.b32.xlu0 %v1513_v54, %s2373_s17 }
 0x28c   : > { %v1459_v55 = vpop.permute.xlu0 %1458  ;;  %v1461_v58 = vpop.permute.xlu1 %1460 }
 0x28d   : > { %v1467_v56 = vmul.f32 0.0, %v1459_v55  ;;  %v1469_v6 = vmul.f32 %v2644_v44, %v1461_v58  ;;  %v1463_v7 = vsel %vm1462_vm13, %v1459_v55, %v1461_v58 }
 0x28e   : > { %v1468_v9 = vmul.f32 %v2649_v50, %v1463_v7  ;;  %v1936_v7 = vld [vmem:[%s2845_s4] sm:$0x3] }
 0x28f   : > { %1473 = vrot.lane.b32.xlu0 %v1467_v56, %s2372_s14 }
 0x290   : > { %v1418_v59 = vpop.permute.xlu0 %1417  ;;  %v1420_v0 = vpop.permute.xlu1 %1419 }
 0x291   : > { %v1426_v62 = vmul.f32 0.0, %v1418_v59  ;;  %v1428_v1 = vmul.f32 %v2644_v44, %v1420_v0  ;;  %v1422_v10 = vsel %vm1421_vm14, %v1418_v59, %v1420_v0  ;;  %v1626_v59 = vld [vmem:[%s2846_s5] sm:$0xf] }
 0x292   : > { %v1427_v13 = vmul.f32 %v2649_v50, %v1422_v10 }
 0x293   : > { %1432 = vrot.lane.b32.xlu1 %v1426_v62, %s2371_s11  ;;  %1616 = vrot.lane.b32.xlu0 %v1609_v61, %s2375_s22  ;;  %v2254_v62 = vld [vmem:[%s2845_s4 + $0x4] sm:$0x3] }
 0x294   : > { %v1361_v11 = vpop.permute.xlu1 %1360  ;;  %v1359_v12 = vpop.permute.xlu0 %1358  ;;  %v2005_v63 = vrot.slane %v2254_v62, %v2531_v25 }
 0x295   : > { %v1363_v14 = vsel %vm1362_vm15, %v1359_v12, %v1361_v11  ;;  %v1369_v15 = vmul.f32 %v2644_v44, %v1361_v11  ;;  %v1367_v17 = vmul.f32 0.0, %v1359_v12  ;;  %v2252_v11 = vld [vmem:[%s2845_s4 + $0x4] sm:$0x3] }
 0x296   : > { %v1368_v16 = vmul.f32 %v2649_v50, %v1363_v14  ;;  %v1814_v12 = vrot.slane %v2252_v11, %v2533_v26 }
 0x297   : > { %1576 = vrot.lane.b32.xlu1 %v2644_v44, %s2368_s23  ;;  %1558 = vrot.lane.b32.xlu0 %v1551_v60, %s2374_s21 }
 0x298   : > { %v1579_v18 = vpop.permute.xlu0 %1578 }
 0x29b   : > { %1436 = vrot.lane.b32.xlu0 %v1428_v1, %s2371_s11  ;;  %1395 = vrot.lane.b32.xlu1 %v2644_v44, %s2363_s18 }
 0x29f   : > { %1393 = vrot.lane.b32.xlu0 %v2649_v50, %s2363_s18  ;;  %1574 = vrot.lane.b32.xlu1 %v2649_v50, %s2368_s23 }
 0x2a3   : > { %1614 = vrot.lane.b32.xlu0 %v1608_v3, %s2375_s22  ;;  %1519 = vrot.lane.b32.xlu1 %v1512_v4, %s2373_s17  ;;  %v2001_v4 = vrot.slane %v2254_v62, %v2533_v26 }
 0x2a7   : > { %1556 = vrot.lane.b32.xlu0 %v1550_v5, %s2374_s21  ;;  %1477 = vrot.lane.b32.xlu1 %v1469_v6, %s2372_s14  ;;  %v2253_v5 = vld [vmem:[%s2845_s4 + $0x4] sm:$0x3] }
 0x2a8   : > { %v1899_v6 = vrot.slane %v2253_v5, %v2533_v26 }
 0x2ab   : > { %1475 = vrot.lane.b32.xlu0 %v1468_v9, %s2372_s14  ;;  %1517 = vrot.lane.b32.xlu1 %v1511_v8, %s2373_s17  ;;  %v1941_v8 = vrot.slane %v1936_v7, %v2533_v26  ;;  %v1848_v9 = vld [vmem:[%s2845_s4] sm:$0x3] }
 0x2ac   : > { %v1853_v10 = vrot.slane %v1848_v9, %v2533_v26 }
 0x2af   : > { %1391 = vrot.lane.b32.xlu0 %v2369_v28, %s2363_s18  ;;  %1434 = vrot.lane.b32.xlu1 %v1427_v13, %s2371_s11  ;;  %v1749_v13 = vld [vmem:[%s2845_s4] sm:$0x3] }
 0x2b0   : > { %v1754_v14 = vrot.slane %v1749_v13, %v2533_v26  ;;  %v1945_v26 = vrot.slane %v1936_v7, %v2531_v25 }
 0x2b3   : > { %1375 = vrot.lane.b32.xlu1 %v1368_v16, %s2370_s8  ;;  %1377 = vrot.lane.b32.xlu0 %v1369_v15, %s2370_s8 }
 0x2b7   : > { %1373 = vrot.lane.b32.xlu1 %v1367_v17, %s2370_s8 }
 0x2bb   : > { %2008 = vrot.lane.b32.xlu1 %v2005_v63, %s2370_s8 }
 0x2f5   : > { %v1619_v19 = vpop.permute.xlu1 %1618 }
 0x2f9   : > { %v1561_v21 = vpop.permute.xlu1 %1560 }
 0x2fd   : > { %v1522_v20 = vpop.permute.xlu0 %1521 }
 0x301   : > { %v1474_v22 = vpop.permute.xlu0 %1473 }
 0x305   : > { %v1433_v23 = vpop.permute.xlu1 %1432  ;;  %v1617_v28 = vpop.permute.xlu0 %1616 }
 0x306   : > { %v1621_v24 = vsel %vm1362_vm15, %v1617_v28, %v1619_v19 }
 0x307   : > { %1663 = vmatprep.subr.mxu0 %v1621_v24  ;;  %v1857_v24 = vrot.slane %v1848_v9, %v2531_v25 }
 0x309   : > { %v1577_v27 = vpop.permute.xlu1 %1576  ;;  %v1559_v29 = vpop.permute.xlu0 %1558 }
 0x30a   : > { %v1582_v30 = vsel %vm1580_vm0, %v1577_v27, %v1579_v18  ;;  %v1563_v31 = vsel %vm1421_vm14, %v1559_v29, %v1561_v21 }
 0x30d   : > { %v1437_v32 = vpop.permute.xlu0 %1436  ;;  %v1396_v33 = vpop.permute.xlu1 %1395 }
 0x311   : > { %v1394_v34 = vpop.permute.xlu0 %1393  ;;  %v1575_v35 = vpop.permute.xlu1 %1574 }
 0x312   : > { %v1398_v36 = vsel %vm469_vm1, %v1394_v34, %v1396_v33  ;;  %v1581_v37 = vsel %vm1580_vm0, %v1575_v35, %v1577_v27  ;;  %v1818_v27 = vrot.slane %v2252_v11, %v2531_v25 }
 0x313   : > { %1402 = vst [vmem:[#allocation3 + $0x58] sm:$0xff] %v1398_v36 }
 0x315   : > { %v1615_v38 = vpop.permute.xlu0 %1614  ;;  %v1520_v39 = vpop.permute.xlu1 %1519 }
 0x316   : > { %v1620_v40 = vsel %vm1362_vm15, %v1615_v38, %v1617_v28  ;;  %v1524_v41 = vsel %vm1462_vm13, %v1520_v39, %v1522_v20  ;;  %v1903_v28 = vrot.slane %v2253_v5, %v2531_v25 }
 0x317   : > { %1664 = vmatpush1.msra.mxu0 %v1620_v40 }
 0x318   : > { %1665 = vmatprep.subr.mxu0 %v1582_v30  ;;  %v1995_v30 = vld [vmem:[#allocation2 + $0x18] sm:$0xf] }
 0x319   : > { %v1557_v42 = vpop.permute.xlu0 %1556  ;;  %v1478_v43 = vpop.permute.xlu1 %1477  ;;  %1666 = vmatpush1.msra.mxu0 %v1581_v37 }
 0x31a   : > { %v1562_v45 = vsel %vm1421_vm14, %v1557_v42, %v1559_v29  ;;  %1667 = vmatprep.subr.mxu0 %v1563_v31  ;;  %v1758_v29 = vrot.slane %v1749_v13, %v2531_v25 }
 0x31b   : > { %1668 = vmatpush1.msra.mxu0 %v1562_v45  ;;  %v1893_v45 = vld [vmem:[#allocation2 + $0x18] sm:$0xf] }
 0x31c   : > { %1669 = vmatprep.subr.mxu0 %v1524_v41 }
 0x31d   : > { %v1476_v46 = vpop.permute.xlu0 %1475  ;;  %v1518_v47 = vpop.permute.xlu1 %1517 }
 0x31e   : > { %v1480_v48 = vsel %vm1479_vm12, %v1474_v22, %v1476_v46  ;;  %v1481_v49 = vsel %vm1479_vm12, %v1476_v46, %v1478_v43  ;;  %v1523_v51 = vsel %vm1462_vm13, %v1518_v47, %v1520_v39  ;;  %v1935_v43 = vld [vmem:[#allocation2 + $0x18] sm:$0xf] }
 0x31f   : > { %1484 = vst [vmem:[#allocation3 + $0x70] sm:$0xff] %v1480_v48  ;;  %1485 = vst [vmem:[#allocation3 + $0x80] sm:$0xff] %v1481_v49  ;;  %1670 = vmatpush1.msra.mxu0 %v1523_v51  ;;  %v1974_v47 = vld [vmem:[#allocation2 + $0x18] sm:$0xf] }
 0x320   : > { %1671 = vmatprep.subr.mxu0 %v2644_v44  ;;  %v1980_v51 = vrot.slane %v1974_v47, 4 }
 0x321   : > { %v1392_v52 = vpop.permute.xlu0 %1391  ;;  %v1435_v53 = vpop.permute.xlu1 %1434  ;;  %1672 = vmatpush1.msra.mxu0 %v2649_v50 }
 0x322   : > { %v1397_v54 = vsel %vm469_vm1, %v1392_v52, %v1394_v34  ;;  %v1439_v55 = vsel %vm1438_vm11, %v1433_v23, %v1435_v53  ;;  %v1440_v56 = vsel %vm1438_vm11, %v1435_v53, %v1437_v32  ;;  %1673 = vmatprep.subr.mxu0 %v1481_v49  ;;  %v1806_v53 = vld [vmem:[#allocation2] sm:$0xf] }
 0x323   : > { %1401 = vst [vmem:[#allocation3 + $0x78] sm:$0xff] %v1397_v54  ;;  %1443 = vst [vmem:[#allocation3 + $0x20] sm:$0xff] %v1439_v55  ;;  %1674 = vmatpush1.msra.mxu0 %v1480_v48 }
 0x324   : > { %1444 = vst [vmem:[#allocation3 + $0x8] sm:$0xff] %v1440_v56  ;;  %1675 = vmatprep.subr.mxu0 %v1440_v56 }
 0x325   : > { %v1376_v57 = vpop.permute.xlu1 %1375  ;;  %v1378_v58 = vpop.permute.xlu0 %1377  ;;  %1676 = vmatpush1.msra.mxu0 %v1439_v55 }
 0x326   : > { %v1380_v44 = vsel %vm300_vm3, %v1376_v57, %v1378_v58  ;;  %1677 = vmatprep.subr.mxu0 %v1398_v36  ;;  %v1845_v36 = vld [vmem:[#allocation2] sm:$0xf] }
 0x327   : > { %1384 = vst [vmem:[#allocation3 + $0x38] sm:$0xff] %v1380_v44  ;;  %1678 = vmatpush1.msra.mxu0 %v1397_v54 }
 0x328   : > { %1679 = vmatprep.subr.mxu0 %v1380_v44 }
 0x329   : > { %v1374_v50 = vpop.permute.xlu1 %1373 }
 0x32a   : > { %v1379_v61 = vsel %vm300_vm3, %v1374_v50, %v1376_v57 }
 0x32b   : > { %1383 = vst [vmem:[#allocation3] sm:$0xff] %v1379_v61  ;;  %1680 = vmatpush1.msra.mxu0 %v1379_v61 }
 0x32c   : > { %2251 = vmatmul.mubr.msk.f32.vlgmr.msra.gmra.mxu0 %vm1645_vm2, %v1626_v59 }
 0x32d   : > { %v2009_v31 = vpop.permute.xlu1 %2008 }
 0x32e   : > { %v2016_v32 = vmul.f32 %v2009_v31, %v1995_v30 }
 0x3ec   : > { %v1715_v60 = vpop.f32.mrf.mxu0 }
 0x3ed   : > { %v1721_v1 = vsel %vm1720_vm4, %v1715_v60, 0.0 }
 0x3ee   : > { %v1717_v0 = vpop.f32.mrf.mxu0 }
 0x3ef   : > { %v1722_v2 = vsel %vm1720_vm4, %v1717_v0, 0.0 }
 0x3f0   : > { %v1723_v3 = vadd.f32 %v1722_v2, %v1721_v1 }
 0x3f2   : > { %1724 = vadd.xlane.f32.xlu0 %v1723_v3 }
 0x408   : > { %2006 = vrot.lane.b32.xlu0 %v2001_v4, %s2370_s8 }
 0x40c   : > { %1904 = vrot.lane.b32.xlu0 %v1899_v6, %s2372_s14 }
 0x410   : > { %1946 = vrot.lane.b32.xlu0 %v1941_v8, %s2371_s11 }
 0x414   : > { %1858 = vrot.lane.b32.xlu0 %v1853_v10, %s2373_s17 }
 0x418   : > { %1819 = vrot.lane.b32.xlu0 %v1814_v12, %s2374_s21 }
 0x41c   : > { %1759 = vrot.lane.b32.xlu0 %v1754_v14, %s2375_s22 }
 0x47b   : > { %v1725_v15 = vpop.xlane.xlu0 %1724 }
 0x47c   : > { %v1727_v16 = vmul.f32 0.00390625, %v1725_v15 }
 0x47e   : > { %v1728_v17 = vsub.f32 %v1715_v60, %v1727_v16  ;;  %v1729_v18 = vsub.f32 %v1717_v0, %v1727_v16 }
 0x47f   : > { %v2007_v33 = vpop.permute.xlu0 %2006 }
 0x480   : > { %v1730_v19 = vmul.f32 %v1728_v17, %v1728_v17  ;;  %v1731_v20 = vmul.f32 %v1729_v18, %v1729_v18  ;;  %v2010_v0 = vsel %vm300_vm3, %v2007_v33, %v2009_v31 }
 0x482   : > { %v1732_v21 = vsel %vm1720_vm4, %v1730_v19, 0.0  ;;  %v1733_v22 = vsel %vm1720_vm4, %v1731_v20, 0.0 }
 0x483   : > { %v1734_v23 = vadd.f32 %v1733_v22, %v1732_v21  ;;  %v2767_v34 = vpop.permute.xlu0 %1904 }
 0x485   : > { %1735 = vadd.xlane.f32.xlu1 %v1734_v23 }
 0x487   : > { %v1947_v35 = vpop.permute.xlu0 %1946 }
 0x48b   : > { %v2769_v37 = vpop.permute.xlu0 %1858 }
 0x48c   : > { %v1866_v38 = vmul.f32 %v2769_v37, %v1845_v36 }
 0x48e   : > { %v1872_v39 = vrot.slane %v1866_v38, 4 }
 0x48f   : > { %v1820_v54 = vpop.permute.xlu0 %1819 }
 0x490   : > { %v1827_v58 = vmul.f32 %v1820_v54, %v1806_v53 }
 0x493   : > { %v1760_v19 = vpop.permute.xlu0 %1759 }
 0x496   : > { %1906 = vrot.lane.b32.xlu1 %v1903_v28, %s2372_s14 }
 0x49a   : > { %1948 = vrot.lane.b32.xlu1 %v1945_v26, %s2371_s11 }
 0x49e   : > { %1860 = vrot.lane.b32.xlu1 %v1857_v24, %s2373_s17 }
 0x4a2   : > { %1821 = vrot.lane.b32.xlu1 %v1818_v27, %s2374_s21 }
 0x4a6   : > { %1761 = vrot.lane.b32.xlu1 %v1758_v29, %s2375_s22 }
 0x4aa   : > { %2024 = vrot.lane.b32.xlu1 %v2016_v32, %s2375_s22 }
 0x4ae   : > { %1875 = vrot.lane.b32.xlu1 %v1872_v39, %s2372_s14 }
 0x50e   : > { %v1736_v25 = vpop.xlane.xlu1 %1735 }
 0x50f   : > { %v1737_v40 = vmul.f32 0.00390625, %v1736_v25 }
 0x511   : > { %v1738_v41 = vadd.f32 1e-05, %v1737_v40 }
 0x512   : > { %v2773_v42 = vpop.permute.xlu1 %1906 }
 0x513   : > { %2350 = vrsqrt.f32 %v1738_v41  ;;  %v1914_v49 = vmul.f32 %v2773_v42, %v1893_v45  ;;  %v1908_v24 = vsel %vm1479_vm12, %v2767_v34, %v2773_v42  ;;  %v1746_v45 = vld [vmem:[#allocation2] sm:$0xf] }
 0x515   : > { %v1920_v52 = vrot.slane %v1914_v49, 4 }
 0x516   : > { %v1949_v46 = vpop.permute.xlu1 %1948 }
 0x517   : > { %v1956_v48 = vmul.f32 %v1949_v46, %v1935_v43  ;;  %v1950_v61 = vsel %vm1438_vm11, %v1947_v35, %v1949_v46  ;;  %v1785_v46 = vld [vmem:[#allocation2] sm:$0xf] }
 0x519   : > { %1964 = vrot.lane.b32.xlu0 %v1956_v48, %s2374_s21 }
 0x51a   : > { %v1861_v63 = vpop.permute.xlu1 %1860 }
 0x51d   : > { %1985 = vrot.lane.b32.xlu0 %v1980_v51, %s2368_s23 }
 0x51e   : > { %v1822_v8 = vpop.permute.xlu1 %1821 }
 0x51f   : > { %v1823_v16 = vsel %vm1421_vm14, %v1820_v54, %v1822_v8 }
 0x520   : > { %v2351_v55 = vpop.eup %2350 }
 0x521   : > { %v1740_v56 = vmul.f32 %v2351_v55, %v1728_v17  ;;  %v1741_v57 = vmul.f32 %v2351_v55, %v1729_v18  ;;  %1925 = vrot.lane.b32.xlu0 %v1920_v52, %s2373_s17 }
 0x522   : > { %v1762_v18 = vpop.permute.xlu1 %1761 }
 0x523   : > { %v1742_v44 = vmax.f32 %v1740_v56, 0.0  ;;  %v1743_v50 = vmax.f32 %v1741_v57, 0.0  ;;  %v1763_v23 = vsel %vm1362_vm15, %v1760_v19, %v1762_v18 }
 0x525   : > { %1744 = vst [vmem:[#allocation2 + $0x8] sm:$0xf] %v1742_v44  ;;  %1745 = vst [vmem:[#allocation2 + $0x10] sm:$0xf] %v1743_v50  ;;  %1833 = vrot.lane.b32.xlu0 %v1827_v58, %s2371_s11 }
 0x526   : > { %v2025_v51 = vpop.permute.xlu1 %2024 }
 0x52a   : > { %v1876_v53 = vpop.permute.xlu1 %1875 }
 0x52c   : > { %v1934_v59 = vld [vmem:[#allocation2 + $0x10] sm:$0xf]  ;;  %v1993_v4 = vld [vmem:[#allocation2 + $0x8] sm:$0xf] }
 0x52d   : > { %v1955_v62 = vmul.f32 %v1950_v61, %v1934_v59  ;;  %v1994_v60 = vld [vmem:[#allocation2 + $0x10] sm:$0xf]  ;;  %v1933_v6 = vld [vmem:[#allocation2 + $0x8] sm:$0xf]  ;;  %v2014_v9 = vmul.f32 %v2007_v33, %v1993_v4 }
 0x52e   : > { %v1973_v1 = vld [vmem:[#allocation2 + $0x10] sm:$0xf]  ;;  %v2015_v2 = vmul.f32 %v2010_v0, %v1994_v60  ;;  %v1887_v7 = vld [vmem:[#allocation2 + $0x8] sm:$0xf]  ;;  %v1954_v10 = vmul.f32 %v1947_v35, %v1933_v6  ;;  %v1862_v35 = vsel %vm1462_vm13, %v2769_v37, %v1861_v63  ;;  %v1767_v37 = vmul.f32 %v1760_v19, %v1746_v45 }
 0x52f   : > { %1962 = vrot.lane.b32.xlu1 %v1955_v62, %s2374_s21  ;;  %v1979_v3 = vrot.slane %v1973_v1, 4  ;;  %v1888_v5 = vld [vmem:[#allocation2 + $0x10] sm:$0xf]  ;;  %1889 = vst [vmem:[#allocation3 + $0x20] sm:$0xf] %v1887_v7 }
 0x530   : > { %2022 = vrot.lane.b32.xlu0 %v2015_v2, %s2375_s22  ;;  %1890 = vst [vmem:[#allocation3 + $0x8] sm:$0xf] %v1888_v5  ;;  %v1972_v11 = vld [vmem:[#allocation2 + $0x8] sm:$0xf]  ;;  %v1808_v12 = vld [vmem:[#allocation2 + $0x10] sm:$0xf] }
 0x531   : > { %v1978_v13 = vrot.slane %v1972_v11, 4  ;;  %v1829_v14 = vmul.f32 %v1822_v8, %v1808_v12  ;;  %v1807_v15 = vld [vmem:[#allocation2 + $0x8] sm:$0xf]  ;;  %v1748_v17 = vld [vmem:[#allocation2 + $0x10] sm:$0xf] }
 0x532   : > { %v1828_v20 = vmul.f32 %v1823_v16, %v1807_v15  ;;  %v1769_v21 = vmul.f32 %v1762_v18, %v1748_v17  ;;  %v1747_v22 = vld [vmem:[#allocation2 + $0x8] sm:$0xf]  ;;  %v1892_v28 = vld [vmem:[#allocation2 + $0x10] sm:$0xf] }
 0x533   : > { %1983 = vrot.lane.b32.xlu1 %v1979_v3, %s2368_s23  ;;  %v1787_v26 = vld [vmem:[#allocation2 + $0x10] sm:$0xf]  ;;  %v1768_v27 = vmul.f32 %v1763_v23, %v1747_v22  ;;  %v1913_v29 = vmul.f32 %v1908_v24, %v1892_v28  ;;  %v1846_v30 = vld [vmem:[#allocation2 + $0x8] sm:$0xf] }
 0x534   : > { %2020 = vrot.lane.b32.xlu0 %v2014_v9, %s2375_s22  ;;  %v1793_v31 = vrot.slane %v1787_v26, 4  ;;  %v1786_v32 = vld [vmem:[#allocation2 + $0x8] sm:$0xf]  ;;  %v1867_v36 = vmul.f32 %v1862_v35, %v1846_v30  ;;  %v1847_v40 = vld [vmem:[#allocation2 + $0x10] sm:$0xf] }
 0x535   : > { %v1891_v33 = vld [vmem:[#allocation2 + $0x8] sm:$0xf]  ;;  %v1792_v38 = vrot.slane %v1786_v32, 4  ;;  %v1919_v25 = vrot.slane %v1913_v29, 4  ;;  %v1868_v43 = vmul.f32 %v1861_v63, %v1847_v40 }
 0x536   : > { %v1912_v39 = vmul.f32 %v2767_v34, %v1891_v33  ;;  %v1873_v41 = vrot.slane %v1867_v36, 4  ;;  %v1791_v34 = vrot.slane %v1785_v46, 4  ;;  %v2032_v33 = vld [vmem:[%s2847_s6] sm:$0xf] }
 0x537   : > { %1960 = vrot.lane.b32.xlu1 %v1954_v10, %s2374_s21  ;;  %v1874_v47 = vrot.slane %v1868_v43, 4 }
 0x538   : > { %1981 = vrot.lane.b32.xlu0 %v1978_v13, %s2368_s23  ;;  %v1918_v42 = vrot.slane %v1912_v39, 4 }
 0x53b   : > { %1837 = vrot.lane.b32.xlu1 %v1829_v14, %s2371_s11 }
 0x53c   : > { %1835 = vrot.lane.b32.xlu0 %v1828_v20, %s2371_s11 }
 0x53f   : > { %1777 = vrot.lane.b32.xlu1 %v1769_v21, %s2370_s8 }
 0x540   : > { %1775 = vrot.lane.b32.xlu0 %v1768_v27, %s2370_s8 }
 0x543   : > { %1798 = vrot.lane.b32.xlu1 %v1793_v31, %s2363_s18 }
 0x544   : > { %1796 = vrot.lane.b32.xlu0 %v1792_v38, %s2363_s18 }
 0x547   : > { %1923 = vrot.lane.b32.xlu1 %v1919_v25, %s2373_s17 }
 0x548   : > { %1877 = vrot.lane.b32.xlu0 %v1873_v41, %s2372_s14 }
 0x54b   : > { %1921 = vrot.lane.b32.xlu1 %v1918_v42, %s2373_s17 }
 0x54c   : > { %1773 = vrot.lane.b32.xlu0 %v1767_v37, %s2370_s8 }
 0x54f   : > { %1879 = vrot.lane.b32.xlu1 %v1874_v47, %s2372_s14  ;;  %s298_s14 = scalar_lea.vmem %s2848_s7, %s2260_s28 }
 0x553   : > { %1794 = vrot.lane.b32.xlu1 %v1791_v34, %s2363_s18 }
 0x58b   : > { %v1965_v48 = vpop.permute.xlu0 %1964 }
 0x58f   : > { %v1986_v49 = vpop.permute.xlu0 %1985 }
 0x593   : > { %v1926_v52 = vpop.permute.xlu0 %1925 }
 0x597   : > { %v1834_v54 = vpop.permute.xlu0 %1833 }
 0x5a1   : > { %v1963_v55 = vpop.permute.xlu1 %1962 }
 0x5a2   : > { %v1967_v56 = vsel %vm1421_vm14, %v1963_v55, %v1965_v48  ;;  %v2023_v57 = vpop.permute.xlu0 %2022 }
 0x5a3   : > { %1971 = vst [vmem:[#allocation3 + $0x80] sm:$0xf] %v1967_v56  ;;  %v2027_v58 = vsel %vm1362_vm15, %v2023_v57, %v2025_v51 }
 0x5a4   : > { %2031 = vst [vmem:[#allocation3 + $0x40] sm:$0xf] %v2027_v58 }
 0x5a5   : > { %v1984_v44 = vpop.permute.xlu1 %1983 }
 0x5a6   : > { %v1988_v50 = vsel %vm1580_vm0, %v1984_v44, %v1986_v49  ;;  %v2021_v59 = vpop.permute.xlu0 %2020 }
 0x5a7   : > { %1992 = vst [vmem:[#allocation3 + $0x80] sm:$0xf0] %v1988_v50  ;;  %v2026_v61 = vsel %vm1362_vm15, %v2021_v59, %v2023_v57 }
 0x5a8   : > { %2030 = vst [vmem:[#allocation3 + $0x88] sm:$0xf] %v2026_v61 }
 0x5a9   : > { %v1961_v62 = vpop.permute.xlu1 %1960 }
 0x5aa   : > { %v1966_v63 = vsel %vm1421_vm14, %v1961_v62, %v1963_v55  ;;  %v1982_v60 = vpop.permute.xlu0 %1981 }
 0x5ab   : > { %1970 = vst [vmem:[#allocation3 + $0x70] sm:$0xf] %v1966_v63  ;;  %v1987_v0 = vsel %vm1580_vm0, %v1982_v60, %v1984_v44  ;;  %v2042_v1 = vld [vmem:[#allocation3 + $0x40] sm:$0xf] }
 0x5ac   : > { %1991 = vst [vmem:[#allocation3 + $0x70] sm:$0xf0] %v1987_v0  ;;  %2255 = vmatprep.subr.msk.mxu1 %vm1720_vm4, %v2042_v1 }
 0x5ad   : > { %v1838_v2 = vpop.permute.xlu1 %1837 }
 0x5ae   : > { %v1836_v3 = vpop.permute.xlu0 %1835  ;;  %v2040_v4 = vld [vmem:[#allocation3 + $0x80] sm:$0xff] }
 0x5af   : > { %v1839_v5 = vsel %vm1438_vm11, %v1834_v54, %v1836_v3  ;;  %v1840_v6 = vsel %vm1438_vm11, %v1836_v3, %v1838_v2  ;;  %v2041_v7 = vld [vmem:[#allocation3 + $0x88] sm:$0xf] }
 0x5b0   : > { %1843 = vst [vmem:[#allocation3 + $0x78] sm:$0xf] %v1839_v5  ;;  %1844 = vst [vmem:[#allocation3 + $0x58] sm:$0xf] %v1840_v6  ;;  %2256 = vmatpush1.msk.msra.mxu1 %vm1720_vm4, %v2041_v7 }
 0x5b1   : > { %v1778_v8 = vpop.permute.xlu1 %1777  ;;  %2077 = vmatprep.subr.mxu1 %v2040_v4 }
 0x5b2   : > { %v1776_v9 = vpop.permute.xlu0 %1775 }
 0x5b3   : > { %v1780_v10 = vsel %vm300_vm3, %v1776_v9, %v1778_v8  ;;  %v2039_v11 = vld [vmem:[#allocation3 + $0x70] sm:$0xff] }
 0x5b4   : > { %1784 = vst [vmem:[#allocation3 + $0x38] sm:$0xf] %v1780_v10  ;;  %2078 = vmatpush1.msra.mxu1 %v2039_v11 }
 0x5b5   : > { %v1799_v12 = vpop.permute.xlu1 %1798 }
 0x5b6   : > { %v1797_v13 = vpop.permute.xlu0 %1796 }
 0x5b7   : > { %v1801_v14 = vsel %vm469_vm1, %v1797_v13, %v1799_v12 }
 0x5b8   : > { %1805 = vst [vmem:[#allocation3 + $0x38] sm:$0xf0] %v1801_v14 }
 0x5b9   : > { %v1924_v15 = vpop.permute.xlu1 %1923 }
 0x5ba   : > { %v1928_v16 = vsel %vm1462_vm13, %v1924_v15, %v1926_v52  ;;  %v1878_v17 = vpop.permute.xlu0 %1877 }
 0x5bb   : > { %1932 = vst [vmem:[#allocation3 + $0x8] sm:$0xf0] %v1928_v16  ;;  %v1881_v18 = vsel %vm1479_vm12, %v1876_v53, %v1878_v17 }
 0x5bc   : > { %1885 = vst [vmem:[#allocation3 + $0x78] sm:$0xf0] %v1881_v18 }
 0x5bd   : > { %v1922_v19 = vpop.permute.xlu1 %1921 }
 0x5be   : > { %v1927_v20 = vsel %vm1462_vm13, %v1922_v19, %v1924_v15  ;;  %v1774_v21 = vpop.permute.xlu0 %1773 }
 0x5bf   : > { %1931 = vst [vmem:[#allocation3 + $0x20] sm:$0xf0] %v1927_v20  ;;  %v1779_v22 = vsel %vm300_vm3, %v1774_v21, %v1776_v9  ;;  %v2034_v32 = vld [vmem:[#allocation3 + $0x38] sm:$0xff]  ;;  %vm2043_vm3 = vcmask 293888  }
 0x5c0   : > { %1783 = vst [vmem:[#allocation3] sm:$0xf] %v1779_v22 }
 0x5c1   : > { %v1880_v23 = vpop.permute.xlu1 %1879 }
 0x5c2   : > { %v1882_v28 = vsel %vm1479_vm12, %v1878_v17, %v1880_v23  ;;  %v2038_v26 = vld [vmem:[#allocation3 + $0x8] sm:$0xff] }
 0x5c3   : > { %1886 = vst [vmem:[#allocation3 + $0x58] sm:$0xf0] %v1882_v28  ;;  %2079 = vmatprep.subr.mxu1 %v2038_v26  ;;  %v2035_v31 = vld [vmem:[#allocation3 + $0x78] sm:$0xff] }
 0x5c5   : > { %v1795_v24 = vpop.permute.xlu1 %1794 }
 0x5c6   : > { %v1800_v27 = vsel %vm469_vm1, %v1795_v24, %v1797_v13  ;;  %v2037_v29 = vld [vmem:[#allocation3 + $0x20] sm:$0xff] }
 0x5c7   : > { %1804 = vst [vmem:[#allocation3] sm:$0xf0] %v1800_v27  ;;  %2080 = vmatpush1.msra.mxu1 %v2037_v29 }
 0x5ca   : > { %v2036_v30 = vld [vmem:[#allocation3 + $0x58] sm:$0xff] }
 0x5cb   : > { %2081 = vmatprep.subr.mxu1 %v2036_v30 }
 0x5cc   : > { %2082 = vmatpush1.msra.mxu1 %v2035_v31 }
 0x5cd   : > { %2083 = vmatprep.subr.mxu1 %v2034_v32 }
 0x5ce   : > { %v2033_v35 = vld [vmem:[#allocation3] sm:$0xff] }
 0x5cf   : > { %2084 = vmatpush1.msra.mxu1 %v2033_v35 }
 0x5d0   : > { %2257 = vmatmul.mubr.msk.f32.vlgmr.msra.gmra.mxu1 %vm2043_vm3, %v2032_v33 }
 0x690   : > { %v2119_v36 = vpop.f32.mrf.mxu1 }
 0x691   : > { %v2124_v39 = vsel %vm1720_vm4, %v2119_v36, 0.0 }
 0x692   : > { %v2121_v38 = vpop.f32.mrf.mxu1 }
 0x693   : > { %v2125_v25 = vsel %vm1720_vm4, %v2121_v38, 0.0 }
 0x694   : > { %v2126_v40 = vadd.f32 %v2125_v25, %v2124_v39 }
 0x696   : > { %2127 = vadd.xlane.f32.xlu0 %v2126_v40 }
 0x71f   : > { %v2128_v41 = vpop.xlane.xlu0 %2127 }
 0x720   : > { %v2129_v42 = vmul.f32 0.00390625, %v2128_v41 }
 0x722   : > { %v2130_v43 = vsub.f32 %v2119_v36, %v2129_v42  ;;  %v2131_v45 = vsub.f32 %v2121_v38, %v2129_v42 }
 0x724   : > { %v2132_v37 = vmul.f32 %v2130_v43, %v2130_v43  ;;  %v2133_v46 = vmul.f32 %v2131_v45, %v2131_v45 }
 0x726   : > { %v2134_v47 = vsel %vm1720_vm4, %v2132_v37, 0.0  ;;  %v2135_v34 = vsel %vm1720_vm4, %v2133_v46, 0.0 }
 0x727   : > { %v2136_v48 = vadd.f32 %v2135_v34, %v2134_v47 }
 0x729   : > { %2137 = vadd.xlane.f32.xlu1 %v2136_v48 }
 0x7b2   : > { %v2138_v49 = vpop.xlane.xlu1 %2137 }
 0x7b3   : > { %v2139_v51 = vmul.f32 0.00390625, %v2138_v49 }
 0x7b5   : > { %v2140_v52 = vadd.f32 1e-05, %v2139_v51 }
 0x7b7   : > { %2352 = vrsqrt.f32 %v2140_v52 }
 0x7c4   : > { %v2353_v53 = vpop.eup %2352 }
 0x7c5   : > { %v2142_v54 = vmul.f32 %v2353_v53, %v2130_v43  ;;  %v2143_v55 = vmul.f32 %v2353_v53, %v2131_v45 }
 0x7c7   : > { %v2144_v56 = vmax.f32 %v2142_v54, 0.0  ;;  %v2145_v57 = vmax.f32 %v2143_v55, 0.0 }
 0x7c9   : > { %v2148_v58 = vcombine.low %v2144_v56, %v2145_v57 }
 0x7cb   : > { %2150 = vst [vmem:[%s298_s14] sm:$0xff] %v2148_v58 }
 0x7cc PF: > { %s17_s24 = sadd.s32 1, %s2360_s24  }
 0x7cd   : > { %p14_p4 = scmp.ge.s32.totalorder %s17_s24, 4  }
 0x7cf   :  { %16 = sbr.rel (!%p14_p4) target bundleno = 1 (0x1), region = 85 }

</bundles_post_ra>
